<compile_context>
chip_gen: v7x
topology: tpu7x:2x2x1
jax: 0.10.0
libtpu: 0.0.40
codegen_flags: <defaults>
</compile_context>

<pallas_src>
import functools

import jax
import jax.numpy as jnp
from jax.experimental import pallas as pl
from jax.experimental.pallas import tpu as pltpu


def _round_up(x, m):
    return ((x + m - 1) // m) * m


def ae_kernel(x_ref,
              w1_ref, b1_ref,
              w2_ref, b2_ref,
              w3_ref, b3_ref,
              w4_ref, b4_ref,
              out_ref):
    """Fused forward pass of the AE module for one batch tile.

    x1 = tanh(x  @ W1 + b1)   # encoder
    x2 =      x1 @ W2 + b2    # bottleneck
    h  = tanh(x2 @ W3 + b3)   # decoder layer 1
    y  =      h  @ W4 + b4    # decoder layer 2

    Matmul operands are in the weights' dtype (bf16 by default) for MXU throughput;
    accumulation, bias adds and tanh are in f32.
    """
    cdt = w1_ref.dtype                       # compute dtype for MXU operands (bf16 or f32)
    x = x_ref[...].astype(cdt)

    x1 = jnp.tanh(
        jnp.dot(x, w1_ref[...], preferred_element_type=jnp.float32) + b1_ref[...])
    x2 = jnp.dot(x1.astype(cdt), w2_ref[...],
                 preferred_element_type=jnp.float32) + b2_ref[...]
    h = jnp.tanh(
        jnp.dot(x2.astype(cdt), w3_ref[...],
                preferred_element_type=jnp.float32) + b3_ref[...])
    y = jnp.dot(h.astype(cdt), w4_ref[...],
                preferred_element_type=jnp.float32) + b4_ref[...]

    out_ref[...] = y.astype(out_ref.dtype)


def _vmem_budget_bytes(tile, F, H, C, param_bytes):
    """Rough VMEM budget: resident params (double-buffered worst case) + I/O tiles + intermediates."""
    io = 2 * 2 * tile * F * 4                       # double-buffered x/out tiles, f32
    inter_f32 = tile * (H + C + H + F) * 4          # f32 intermediates per tile
    inter_cast = tile * (F + H + C + H) * 2         # bf16-cast copies per tile
    budget = 2 * param_bytes + io + 2 * (inter_f32 + inter_cast) + (4 << 20)
    # Clamp so we never exceed v7x's 64 MiB physical VMEM (leave headroom).
    return min(max(budget, 16 << 20), 56 << 20)


@functools.partial(jax.jit, static_argnames=("batch_tile", "compute_dtype"))
def ae_forward(x, params, *, batch_tile=256, compute_dtype=jnp.bfloat16):
    """Run the fused AE forward pass with a grid over batch tiles.

    Handles arbitrary batch sizes via zero-padding; keeps the grid length >= 2 for
    realistic batches so the "parallel" batch axis can be sharded across TensorCores.
    """
    (w1, b1), (w2, b2), (w3, b3), (w4, b4) = params
    B, F = x.shape
    H = w1.shape[1]          # 10 * nfeatures
    C = w2.shape[1]          # bottleneck size c

    # Cast weights once to the MXU compute dtype (biases stay f32 for the VPU adds).
    w1c, w2c, w3c, w4c = (w.astype(compute_dtype) for w in (w1, w2, w3, w4))
    b1f, b2f, b3f, b4f = (b.astype(jnp.float32) for b in (b1, b2, b3, b4))

    # Effective batch tile: multiple of 8 (sublane), no larger than the padded batch.
    tile = max(8, min(batch_tile, _round_up(B, 8)))
    tile = _round_up(tile, 8)
    n_tiles = pl.cdiv(B, tile)
    B_pad = n_tiles * tile
    x_in = x if B_pad == B else jnp.pad(x, ((0, B_pad - B), (0, 0)))

    # Full-array (non-tiled) specs for weights/biases: block == full shape, constant index.
    def full_spec(arr):
        nd = arr.ndim
        return pl.BlockSpec(arr.shape, lambda i, _nd=nd: (0,) * _nd)

    x_spec = pl.BlockSpec((tile, F), lambda i: (i, 0))
    out_spec = pl.BlockSpec((tile, F), lambda i: (i, 0))

    param_bytes = sum(int(a.size) * a.dtype.itemsize
                      for a in (w1c, w2c, w3c, w4c, b1f, b2f, b3f, b4f))
    vmem_limit = _vmem_budget_bytes(tile, F, H, C, param_bytes)

    out_padded = pl.pallas_call(
        ae_kernel,
        out_shape=jax.ShapeDtypeStruct((B_pad, F), x.dtype),
        grid_spec=pltpu.PrefetchScalarGridSpec(
            num_scalar_prefetch=0,
            grid=(n_tiles,),
            in_specs=[
                x_spec,
                full_spec(w1c), full_spec(b1f),
                full_spec(w2c), full_spec(b2f),
                full_spec(w3c), full_spec(b3f),
                full_spec(w4c), full_spec(b4f),
            ],
            out_specs=out_spec,
        ),
        compiler_params=pltpu.CompilerParams(
            dimension_semantics=("parallel",),
            vmem_limit_bytes=int(vmem_limit)),
    )(x_in, w1c, b1f, w2c, b2f, w3c, b3f, w4c, b4f)

    return out_padded[:B]


def init_linear(key, fan_in, fan_out, dtype=jnp.float32):
    """Deterministic init mimicking torch.nn.Linear default (uniform +-1/sqrt(fan_in))."""
    kw, kb = jax.random.split(key)
    bound = 1.0 / jnp.sqrt(jnp.asarray(fan_in, dtype))
    # Stored as (in, out) so the kernel computes x @ W.
    w = jax.random.uniform(kw, (fan_in, fan_out), dtype, -bound, bound)
    b = jax.random.uniform(kb, (1, fan_out), dtype, -bound, bound)
    return w, b


def make_params(key, nfeatures, c):
    # TODO(synk): hidden width 10*nfeatures=320 is 2.5 lane-tiles; rounding to a multiple of
    # 128 would remove MXU/vreg padding but would change the module's architecture, so we keep it.
    h = 10 * nfeatures
    k1, k2, k3, k4 = jax.random.split(key, 4)
    return (
        init_linear(k1, nfeatures, h),   # encoder Linear(nfeatures, 10*nfeatures)
        init_linear(k2, h, c),           # bottleneck Linear(10*nfeatures, c)
        init_linear(k3, c, h),           # decoder Linear(c, 10*nfeatures)
        init_linear(k4, h, nfeatures),   # decoder Linear(10*nfeatures, nfeatures)
    )


def ae_reference(x, params, compute_dtype=jnp.float32):
    """Pure-JAX reference identical to the PyTorch forward (optionally mimicking bf16 operands)."""
    (w1, b1), (w2, b2), (w3, b3), (w4, b4) = params
    c = lambda a: a.astype(compute_dtype)
    x1 = jnp.tanh(jnp.dot(c(x), c(w1), preferred_element_type=jnp.float32) + b1)
    x2 = jnp.dot(c(x1), c(w2), preferred_element_type=jnp.float32) + b2
    h = jnp.tanh(jnp.dot(c(x2), c(w3), preferred_element_type=jnp.float32) + b3)
    return jnp.dot(c(h), c(w4), preferred_element_type=jnp.float32) + b4


if __name__ == "__main__":
    nfeatures = 32      # FEATS.shape[1] in the original script (synthetic here)
    c = 8               # bottleneck dimension
    batch = 500         # not a multiple of the tile: exercises the cdiv/padding path (grid = 2)

    key = jax.random.PRNGKey(0)
    kx, kp = jax.random.split(key)

    x = jax.random.normal(kx, (batch, nfeatures), jnp.float32)
    params = make_params(kp, nfeatures, c)

    y = ae_forward(x, params, batch_tile=256, compute_dtype=jnp.bfloat16)
    y = jax.block_until_ready(y)
    assert y.shape == (batch, nfeatures)

    # Check against a reference using the same bf16-operand / f32-accumulate precision.
    y_ref_bf16 = ae_reference(x, params, compute_dtype=jnp.bfloat16)
    assert jnp.allclose(y, y_ref_bf16, atol=2e-4, rtol=1e-3), "mismatch vs bf16-matched reference"

    # Sanity check against the exact f32 PyTorch-equivalent forward (looser tolerance for bf16 operands).
    y_ref_f32 = ae_reference(x, params, compute_dtype=jnp.float32)
    assert jnp.allclose(y, y_ref_f32, atol=5e-2), "mismatch vs f32 reference beyond bf16 tolerance"

    print("KERNEL_OK")
</pallas_src>

<mosaic_0001>
module attributes {stable_mosaic.version = 11 : i64} {
  func.func @ae_kernel(%arg0: i32, %arg1: memref<256x32xf32, #tpu.memory_space<vmem>>, %arg2: memref<32x320xbf16, #tpu.memory_space<vmem>>, %arg3: memref<1x320xf32, #tpu.memory_space<vmem>>, %arg4: memref<320x8xbf16, #tpu.memory_space<vmem>>, %arg5: memref<1x8xf32, #tpu.memory_space<vmem>>, %arg6: memref<8x320xbf16, #tpu.memory_space<vmem>>, %arg7: memref<1x320xf32, #tpu.memory_space<vmem>>, %arg8: memref<320x32xbf16, #tpu.memory_space<vmem>>, %arg9: memref<1x32xf32, #tpu.memory_space<vmem>>, %arg10: memref<256x32xf32, #tpu.memory_space<vmem>>) attributes {dimension_semantics = [#tpu.dimension_semantics<parallel>], iteration_bounds = array<i64: 2>, scalar_prefetch = 0 : i64, scratch_operands = 0 : i64, tpu.core_type = #tpu.core_type<tc>, window_params = [{transform_indices = @transform_0, window_bounds = array<i64: 256, 32>}, {pipeline_mode = #tpu.pipeline_mode<synchronous>, transform_indices = @transform_1, window_bounds = array<i64: 32, 320>}, {pipeline_mode = #tpu.pipeline_mode<synchronous>, transform_indices = @transform_2, window_bounds = array<i64: 1, 320>}, {pipeline_mode = #tpu.pipeline_mode<synchronous>, transform_indices = @transform_3, window_bounds = array<i64: 320, 8>}, {pipeline_mode = #tpu.pipeline_mode<synchronous>, transform_indices = @transform_4, window_bounds = array<i64: 1, 8>}, {pipeline_mode = #tpu.pipeline_mode<synchronous>, transform_indices = @transform_5, window_bounds = array<i64: 8, 320>}, {pipeline_mode = #tpu.pipeline_mode<synchronous>, transform_indices = @transform_6, window_bounds = array<i64: 1, 320>}, {pipeline_mode = #tpu.pipeline_mode<synchronous>, transform_indices = @transform_7, window_bounds = array<i64: 320, 32>}, {pipeline_mode = #tpu.pipeline_mode<synchronous>, transform_indices = @transform_8, window_bounds = array<i64: 1, 32>}, {transform_indices = @transform_9, window_bounds = array<i64: 256, 32>}]} {
    %c0 = arith.constant 0 : index
    %c0_0 = arith.constant 0 : index
    %0 = vector.load %arg1[%c0, %c0_0] : memref<256x32xf32, #tpu.memory_space<vmem>>, vector<256x32xf32>
    %1 = arith.truncf %0 : vector<256x32xf32> to vector<256x32xbf16>
    %c0_1 = arith.constant 0 : index
    %c0_2 = arith.constant 0 : index
    %2 = vector.load %arg2[%c0_1, %c0_2] : memref<32x320xbf16, #tpu.memory_space<vmem>>, vector<32x320xbf16>
    %cst = arith.constant dense<0.000000e+00> : vector<256x320xf32>
    %3 = tpu.matmul %1, %2, %cst {dimension_numbers = #tpu.dot_dimension_numbers<[1], [0], [0], [1], [0, 0, 1, 1], [], []>} : vector<256x32xbf16>, vector<32x320xbf16>, vector<256x320xf32> -> vector<256x320xf32>
    %c0_3 = arith.constant 0 : index
    %c0_4 = arith.constant 0 : index
    %4 = vector.load %arg3[%c0_3, %c0_4] : memref<1x320xf32, #tpu.memory_space<vmem>>, vector<1x320xf32>
    %5 = vector.broadcast %4 : vector<1x320xf32> to vector<256x320xf32>
    %6 = arith.addf %3, %5 : vector<256x320xf32>
    %7 = math.tanh %6 : vector<256x320xf32>
    %8 = arith.truncf %7 : vector<256x320xf32> to vector<256x320xbf16>
    %c0_5 = arith.constant 0 : index
    %c0_6 = arith.constant 0 : index
    %9 = vector.load %arg4[%c0_5, %c0_6] : memref<320x8xbf16, #tpu.memory_space<vmem>>, vector<320x8xbf16>
    %cst_7 = arith.constant dense<0.000000e+00> : vector<256x8xf32>
    %10 = tpu.matmul %8, %9, %cst_7 {dimension_numbers = #tpu.dot_dimension_numbers<[1], [0], [0], [1], [0, 0, 1, 1], [], []>} : vector<256x320xbf16>, vector<320x8xbf16>, vector<256x8xf32> -> vector<256x8xf32>
    %c0_8 = arith.constant 0 : index
    %c0_9 = arith.constant 0 : index
    %11 = vector.load %arg5[%c0_8, %c0_9] : memref<1x8xf32, #tpu.memory_space<vmem>>, vector<1x8xf32>
    %12 = vector.broadcast %11 : vector<1x8xf32> to vector<256x8xf32>
    %13 = arith.addf %10, %12 : vector<256x8xf32>
    %14 = arith.truncf %13 : vector<256x8xf32> to vector<256x8xbf16>
    %c0_10 = arith.constant 0 : index
    %c0_11 = arith.constant 0 : index
    %15 = vector.load %arg6[%c0_10, %c0_11] : memref<8x320xbf16, #tpu.memory_space<vmem>>, vector<8x320xbf16>
    %cst_12 = arith.constant dense<0.000000e+00> : vector<256x320xf32>
    %16 = tpu.matmul %14, %15, %cst_12 {dimension_numbers = #tpu.dot_dimension_numbers<[1], [0], [0], [1], [0, 0, 1, 1], [], []>} : vector<256x8xbf16>, vector<8x320xbf16>, vector<256x320xf32> -> vector<256x320xf32>
    %c0_13 = arith.constant 0 : index
    %c0_14 = arith.constant 0 : index
    %17 = vector.load %arg7[%c0_13, %c0_14] : memref<1x320xf32, #tpu.memory_space<vmem>>, vector<1x320xf32>
    %18 = vector.broadcast %17 : vector<1x320xf32> to vector<256x320xf32>
    %19 = arith.addf %16, %18 : vector<256x320xf32>
    %20 = math.tanh %19 : vector<256x320xf32>
    %21 = arith.truncf %20 : vector<256x320xf32> to vector<256x320xbf16>
    %c0_15 = arith.constant 0 : index
    %c0_16 = arith.constant 0 : index
    %22 = vector.load %arg8[%c0_15, %c0_16] : memref<320x32xbf16, #tpu.memory_space<vmem>>, vector<320x32xbf16>
    %cst_17 = arith.constant dense<0.000000e+00> : vector<256x32xf32>
    %23 = tpu.matmul %21, %22, %cst_17 {dimension_numbers = #tpu.dot_dimension_numbers<[1], [0], [0], [1], [0, 0, 1, 1], [], []>} : vector<256x320xbf16>, vector<320x32xbf16>, vector<256x32xf32> -> vector<256x32xf32>
    %c0_18 = arith.constant 0 : index
    %c0_19 = arith.constant 0 : index
    %24 = vector.load %arg9[%c0_18, %c0_19] : memref<1x32xf32, #tpu.memory_space<vmem>>, vector<1x32xf32>
    %25 = vector.broadcast %24 : vector<1x32xf32> to vector<256x32xf32>
    %26 = arith.addf %23, %25 : vector<256x32xf32>
    %c0_20 = arith.constant 0 : index
    %c0_21 = arith.constant 0 : index
    %27 = vector.load %arg10[%c0_20, %c0_21] : memref<256x32xf32, #tpu.memory_space<vmem>>, vector<256x32xf32>
    tpu.vector_store %arg10[%c0_20, %c0_21], %26 {strides = array<i32>} : memref<256x32xf32, #tpu.memory_space<vmem>>, vector<256x32xf32>,
    return
  }
  func.func @transform_0(%arg0: i32) -> (i32, i32) {
    %c0_i32 = arith.constant 0 : i32
    %c0_i32_0 = arith.constant 0 : i32
    return %arg0, %c0_i32 : i32, i32
  }
  func.func @transform_1(%arg0: i32) -> (i32, i32) {
    %c0_i32 = arith.constant 0 : i32
    %c0_i32_0 = arith.constant 0 : i32
    %c0_i32_1 = arith.constant 0 : i32
    return %c0_i32, %c0_i32_0 : i32, i32
  }
  func.func @transform_2(%arg0: i32) -> (i32, i32) {
    %c0_i32 = arith.constant 0 : i32
    %c0_i32_0 = arith.constant 0 : i32
    %c0_i32_1 = arith.constant 0 : i32
    return %c0_i32, %c0_i32_0 : i32, i32
  }
  func.func @transform_3(%arg0: i32) -> (i32, i32) {
    %c0_i32 = arith.constant 0 : i32
    %c0_i32_0 = arith.constant 0 : i32
    %c0_i32_1 = arith.constant 0 : i32
    return %c0_i32, %c0_i32_0 : i32, i32
  }
  func.func @transform_4(%arg0: i32) -> (i32, i32) {
    %c0_i32 = arith.constant 0 : i32
    %c0_i32_0 = arith.constant 0 : i32
    %c0_i32_1 = arith.constant 0 : i32
    return %c0_i32, %c0_i32_0 : i32, i32
  }
  func.func @transform_5(%arg0: i32) -> (i32, i32) {
    %c0_i32 = arith.constant 0 : i32
    %c0_i32_0 = arith.constant 0 : i32
    %c0_i32_1 = arith.constant 0 : i32
    return %c0_i32, %c0_i32_0 : i32, i32
  }
  func.func @transform_6(%arg0: i32) -> (i32, i32) {
    %c0_i32 = arith.constant 0 : i32
    %c0_i32_0 = arith.constant 0 : i32
    %c0_i32_1 = arith.constant 0 : i32
    return %c0_i32, %c0_i32_0 : i32, i32
  }
  func.func @transform_7(%arg0: i32) -> (i32, i32) {
    %c0_i32 = arith.constant 0 : i32
    %c0_i32_0 = arith.constant 0 : i32
    %c0_i32_1 = arith.constant 0 : i32
    return %c0_i32, %c0_i32_0 : i32, i32
  }
  func.func @transform_8(%arg0: i32) -> (i32, i32) {
    %c0_i32 = arith.constant 0 : i32
    %c0_i32_0 = arith.constant 0 : i32
    %c0_i32_1 = arith.constant 0 : i32
    return %c0_i32, %c0_i32_0 : i32, i32
  }
  func.func @transform_9(%arg0: i32) -> (i32, i32) {
    %c0_i32 = arith.constant 0 : i32
    %c0_i32_0 = arith.constant 0 : i32
    return %arg0, %c0_i32 : i32, i32
  }
}

</mosaic_0001>

<bundles_post_ra>
// kernel: ae_forward.1
= control target key start
LH: loop header
LB: loop body
LE: loop exit
PB: predicated region body
PF: predicated region fallthrough
CT: control target
= control target key end

     0   :  { %s3864_s30 = smov 0   ;;  %s4637_s0 = inlined_call_operand.vmem [shape: f32[512,32], index: 0, kind: input, shape index: {}]   ;;  %s4638_s1 = inlined_call_operand.vmem [shape: bf16[32,320], index: 1, kind: input, shape index: {}]   ;;  %s4639_s2 = inlined_call_operand.vmem [shape: f32[1,320], index: 2, kind: input, shape index: {}]   ;;  %s4640_s3 = inlined_call_operand.vmem [shape: bf16[320,8], index: 3, kind: input, shape index: {}]   ;;  %s4641_s4 = inlined_call_operand.vmem [shape: f32[1,8], index: 4, kind: input, shape index: {}]   ;;  %s4642_s5 = inlined_call_operand.vmem [shape: bf16[8,320], index: 5, kind: input, shape index: {}]   ;;  %s4643_s6 = inlined_call_operand.vmem [shape: f32[1,320], index: 6, kind: input, shape index: {}]   ;;  %s4644_s7 = inlined_call_operand.vmem [shape: bf16[320,32], index: 7, kind: input, shape index: {}]   ;;  %s4645_s8 = inlined_call_operand.vmem [shape: f32[1,32], index: 8, kind: input, shape index: {}]   ;;  %s4646_s9 = inlined_call_operand.vmem [shape: f32[512,32], index: 9, kind: output, shape index: {}]  }
   0x1 LB: > { %s2752_s10 = sadd.s32 4294967295, %s3811_s30   ;;  %p2756_p0 = scmp.ge.s32.totalorder %s3811_s30, 1  ;;  %s3811_s30 = sphi %s3864_s30, %s19_s30  }
   0x2   : > { %p288_p1 = scmp.lt.s32.totalorder %s3811_s30, 3 }
   0x4   : > { %p289_p2 = pnand %p2756_p0, %p288_p1 }
   0x5   : > { %v3370_v0 = vld [vmem:[%s4638_s1 + $0x4] ss:$12 sps:$4 sm:$0xff] (!%p289_p2)   ;;  %s2757_s13 = sshll.u32 (!%p289_p2), %s2752_s10, 5  ;;  %v3372_v1 = vld [vmem:[%s4638_s1 + $0x8] ss:$12 sps:$4 sm:$0xff] (!%p289_p2)   ;;  %v3813_v2 = vmov (!%p289_p2), 0  }
   0x6   : > { %292 = sbr.rel (%p289_p2) target bundleno = 1054 (0x41e), region = 56  ;;  %523 = vmatprep.mubr.bf16.mxu0 (!%p289_p2), %v3813_v2  ;;  %491 = vmatprep.subr.bf16.mxu0 (!%p289_p2), %v3370_v0  ;;  %v3373_v3 = vld [vmem:[%s4638_s1] ss:$12 sps:$4 sm:$0xff] (!%p289_p2)   ;;  %p325_p3 = scmp.lt.s32.totalorder (!%p289_p2), %s2757_s13, 63  ;;  %v3374_v4 = vld [vmem:[%s4638_s1 + $0x1c] ss:$12 sps:$4 sm:$0xff] (!%p289_p2)  }
   0x7   : > { %3210 = vmatprep.subr.bf16.mxu1 (!%p289_p2), %v3372_v1  ;;  %492 = vmatpush1.bf16.msra.mxu0 (!%p289_p2), %v3373_v3  ;;  %v3376_v5 = vld [vmem:[%s4638_s1 + $0x20] ss:$12 sps:$4 sm:$0xff] (!%p289_p2)   ;;  %v3377_v6 = vld [vmem:[%s4638_s1 + $0x18] ss:$12 sps:$4 sm:$0xff] (!%p289_p2)   ;;  %vm442_vm0 = vcmask (!%p289_p2), 261120   ;;  %v3382_v30 = vld [vmem:[%s4640_s3 + $0x90] sm:$0xff] (!%p289_p2)  }
   0x8   : > { %3211 = vmatpush3.bf16.msra.mxu1 (!%p289_p2), %v3372_v1  ;;  %v3378_v7 = vld [vmem:[%s4640_s3 + $0x80] sm:$0xff] (!%p289_p2)   ;;  %493 = vmatprep.subr.bf16.mxu0 (!%p289_p2), %v3374_v4  ;;  %v3379_v18 = vld [vmem:[%s4640_s3 + $0x88] sm:$0xff] (!%p289_p2)   ;;  %v3385_v33 = vld [vmem:[%s4640_s3 + $0x50] sm:$0xff] (!%p289_p2)   ;;  %vm1619_vm1 = vcmask (!%p289_p2), 1043456   ;;  %vm1156_vm2 = vcmask (!%p289_p2), 523264   ;;  %vm1570_vm3 = vcmask (!%p289_p2), 64512  }
   0x9   : > { %3212 = vmatprep.subr.bf16.mxu1 (!%p289_p2), %v3376_v5  ;;  %v3380_v8 = vld [vmem:[%s4640_s3 + $0x40] sm:$0xff] (!%p289_p2)   ;;  %v3383_v31 = vld [vmem:[%s4640_s3 + $0x48] sm:$0xff] (!%p289_p2)   ;;  %v3386_v36 = vld [vmem:[%s4640_s3 + $0x10] sm:$0xff] (!%p289_p2)  }
   0xa   : > { %v3381_v27 = vld [vmem:[%s4640_s3] sm:$0xff] (!%p289_p2)   ;;  %v3384_v32 = vld [vmem:[%s4640_s3 + $0x8] sm:$0xff] (!%p289_p2)   ;;  %v3387_v37 = vld [vmem:[%s4640_s3 + $0x58] sm:$0xff] (!%p289_p2)  }
   0xb   : > { %494 = vmatpush1.bf16.msra.mxu0 (!%p289_p2), %v3377_v6  ;;  %v3388_v42 = vld [vmem:[%s4640_s3 + $0x18] sm:$0xff] (!%p289_p2)   ;;  %v3389_v44 = vld [vmem:[%s4640_s3 + $0x60] sm:$0xff] (!%p289_p2)   ;;  %v3392_v47 = vld [vmem:[%s4640_s3 + $0x68] sm:$0xff] (!%p289_p2)  }
   0xc   : > { %3213 = vmatpush3.bf16.msra.mxu1 (!%p289_p2), %v3376_v5  ;;  %3246 = vmatprep.subr.bf16.mxu0 (!%p289_p2), %v3378_v7  ;;  %v3391_v43 = vld [vmem:[%s4640_s3 + $0x98] sm:$0xff] (!%p289_p2)   ;;  %v3390_v45 = vld [vmem:[%s4640_s3 + $0x20] sm:$0xff] (!%p289_p2)   ;;  %v3393_v51 = vld [vmem:[%s4640_s3 + $0x28] sm:$0xff] (!%p289_p2)  }
   0xd   : > { %s4648_s13 = smov (!%p325_p3, %s2757_s13), 63  ;;  %2929 = vmatprep.subr.bf16.mxu1 %v3380_v8  ;;  %v3394_v8 = vld [vmem:[%s4640_s3 + $0x70] sm:$0xff]  }
   0xe   : > { %s2758_s26 = sshll.u32 %s4648_s13, 3 }
   0xf   : > { %s3902_s29 = scalar_lea.vmem %s4637_s0, %s2758_s26  ;;  %s4537_s14 = scalar_lea.vmem %s4646_s9, %s2758_s26 }
  0x10   : > { %v337_v9 = vld [vmem:[%s3902_s29] sm:$0xff]  ;;  %v338_v10 = vld [vmem:[%s3902_s29 + $0x8] sm:$0xff]  ;;  %v339_v11 = vld [vmem:[%s3902_s29 + $0x10] sm:$0xff] }
  0x11   : > { %v369_v12 = vpack.c.bf16 %v338_v10, %v337_v9  ;;  %v340_v13 = vld [vmem:[%s3902_s29 + $0x18] sm:$0xff]  ;;  %v341_v14 = vld [vmem:[%s3902_s29 + $0x20] sm:$0xff]  ;;  %v342_v15 = vld [vmem:[%s3902_s29 + $0x28] sm:$0xff] }
  0x12   : > { %v370_v16 = vpack.c.bf16 %v340_v13, %v339_v11  ;;  %v371_v17 = vpack.c.bf16 %v342_v15, %v341_v14  ;;  %v343_v19 = vld [vmem:[%s3902_s29 + $0x30] sm:$0xff]  ;;  %v344_v20 = vld [vmem:[%s3902_s29 + $0x38] sm:$0xff]  ;;  %v345_v21 = vld [vmem:[%s3902_s29 + $0x40] sm:$0xff] }
  0x13   : > { %3214 = vmatprep.mubr.msk.bf16.mxu1 %vm442_vm0, %v369_v12  ;;  %2767 = vmatmul.mubr.msk.bf16.vlgmr.msra.gmra.mrb[0].mxu0 %vm442_vm0, %v369_v12  ;;  %v346_v22 = vld [vmem:[%s3902_s29 + $0x48] sm:$0xff]  ;;  %v372_v23 = vpack.c.bf16 %v344_v20, %v343_v19  ;;  %v347_v25 = vld [vmem:[%s3902_s29 + $0x50] sm:$0xff]  ;;  %v348_v26 = vld [vmem:[%s3902_s29 + $0x58] sm:$0xff]  ;;  %v395_v12 = vlaneseq }
  0x14   : > { %3215 = vmatmul.mubr.msk.bf16.vlgmr.msra.gmra.mrb[0].mxu1 %vm442_vm0, %v370_v16  ;;  %533 = vmatprep.mubr.bf16.mxu0 %v3813_v2  ;;  %v373_v24 = vpack.c.bf16 %v346_v22, %v345_v21  ;;  %v349_v28 = vld [vmem:[%s3902_s29 + $0x60] sm:$0xff]  ;;  %v350_v29 = vld [vmem:[%s3902_s29 + $0x68] sm:$0xff]  ;;  %v374_v34 = vpack.c.bf16 %v348_v26, %v347_v25  ;;  %v351_v38 = vld [vmem:[%s3902_s29 + $0x70] sm:$0xff] }
  0x15   : > { %3218 = vmatprep.mubr.msk.bf16.mxu1 %vm442_vm0, %v371_v17  ;;  %3247 = vmatpush3.bf16.msra.mxu0 %v3378_v7  ;;  %v375_v35 = vpack.c.bf16 %v350_v29, %v349_v28  ;;  %v352_v39 = vld [vmem:[%s3902_s29 + $0x78] sm:$0xff]  ;;  %v353_v40 = vld [vmem:[%s3902_s29 + $0x80] sm:$0xff]  ;;  %v354_v41 = vld [vmem:[%s3902_s29 + $0x88] sm:$0xff]  ;;  %v4040_v13 = vshrl.u32 %v395_v12, 7 }
  0x16   : > { %3248 = vmatprep.subr.bf16.mxu0 %v3379_v18  ;;  %2930 = vmatpush3.bf16.msra.mxu1 %v3381_v27  ;;  %v376_v46 = vpack.c.bf16 %v352_v39, %v351_v38  ;;  %v377_v48 = vpack.c.bf16 %v354_v41, %v353_v40  ;;  %v355_v49 = vld [vmem:[%s3902_s29 + $0x90] sm:$0xff]  ;;  %v356_v50 = vld [vmem:[%s3902_s29 + $0x98] sm:$0xff]  ;;  %v357_v52 = vld [vmem:[%s3902_s29 + $0xa0] sm:$0xff] }
  0x17   : > { %2931 = vmatprep.subr.bf16.mxu1 %v3383_v31  ;;  %v358_v53 = vld [vmem:[%s3902_s29 + $0xa8] sm:$0xff]  ;;  %v378_v54 = vpack.c.bf16 %v356_v50, %v355_v49  ;;  %v359_v56 = vld [vmem:[%s3902_s29 + $0xb0] sm:$0xff]  ;;  %v360_v57 = vld [vmem:[%s3902_s29 + $0xb8] sm:$0xff]  ;;  %v397_v14 = vsub.s32 0, %v4040_v13 }
  0x18   : > { %v379_v55 = vpack.c.bf16 %v358_v53, %v357_v52  ;;  %v361_v58 = vld [vmem:[%s3902_s29 + $0xc0] sm:$0xff]  ;;  %v362_v59 = vld [vmem:[%s3902_s29 + $0xc8] sm:$0xff]  ;;  %v380_v60 = vpack.c.bf16 %v360_v57, %v359_v56  ;;  %v363_v62 = vld [vmem:[%s3902_s29 + $0xd0] sm:$0xff] }
  0x19   : > { %3249 = vmatpush3.bf16.msra.mxu0 %v3379_v18  ;;  %v381_v61 = vpack.c.bf16 %v362_v59, %v361_v58  ;;  %v364_v63 = vld [vmem:[%s3902_s29 + $0xd8] sm:$0xff]  ;;  %v365_v0 = vld [vmem:[%s3902_s29 + $0xe0] sm:$0xff]  ;;  %v366_v1 = vld [vmem:[%s3902_s29 + $0xe8] sm:$0xff] }
  0x1a   : > { %3250 = vmatprep.subr.bf16.mxu0 %v3382_v30  ;;  %2932 = vmatpush3.bf16.msra.mxu1 %v3384_v32  ;;  %v382_v3 = vpack.c.bf16 %v364_v63, %v363_v62  ;;  %v383_v4 = vpack.c.bf16 %v366_v1, %v365_v0  ;;  %v367_v5 = vld [vmem:[%s3902_s29 + $0xf0] sm:$0xff]  ;;  %v368_v6 = vld [vmem:[%s3902_s29 + $0xf8] sm:$0xff]  ;;  %v393_v15 = vld [vmem:[%s4639_s2] sm:$0x7] }
  0x1b   : > { %2768 = vmatmul.mubr.msk.bf16.gmra.mrb[4].mxu0 %vm442_vm0, %v370_v16  ;;  %2933 = vmatprep.subr.bf16.mxu1 %v3385_v33  ;;  %v384_v7 = vpack.c.bf16 %v368_v6, %v367_v5  ;;  %v3395_v9 = vld [vmem:[%s4640_s3 + $0x30] sm:$0xff]   ;;  %v3396_v10 = vld [vmem:[%s4640_s3 + $0x78] sm:$0xff]   ;;  %v405_v16 = vsub.s32 2, %v4040_v13  ;;  %v4050_v18 = vrot.slane %v393_v15, %v397_v14  ;;  %v1543_v56 = vld [vmem:[%s4642_s5] sm:$0xff] }
  0x1c   : > { %3219 = vmatmul.mubr.msk.bf16.gmra.mrb[4].mxu1 %vm442_vm0, %v372_v23  ;;  %543 = vmatprep.mubr.bf16.mxu0 %v3813_v2  ;;  %v3397_v11 = vld [vmem:[%s4640_s3 + $0x38] sm:$0xff]   ;;  %v3400_v57 = vld [vmem:[%s4642_s5 + $0x8] ss:$0 sps:$4 sm:$0xff]  }
  0x1d   : > { %3222 = vmatprep.mubr.msk.bf16.mxu1 %vm442_vm0, %v373_v24  ;;  %3251 = vmatpush3.bf16.msra.mxu0 %v3382_v30  ;;  %v4054_v19 = vrot.slane %v393_v15, %v405_v16 }
  0x1e   : > { %2934 = vmatpush3.bf16.msra.mxu1 %v3386_v36  ;;  %3252 = vmatprep.subr.bf16.mxu0 %v3391_v43 }
  0x1f   : > { %2935 = vmatprep.subr.bf16.mxu1 %v3387_v37 }
  0x21   : > { %3253 = vmatpush3.bf16.msra.mxu0 %v3391_v43 }
  0x22   : > { %2936 = vmatpush3.bf16.msra.mxu1 %v3388_v42 }
  0x23   : > { %2769 = vmatmul.mubr.msk.bf16.gmra.mrb[8].mxu0 %vm442_vm0, %v371_v17  ;;  %2937 = vmatprep.subr.bf16.mxu1 %v3389_v44  ;;  %v401_v17 = vsub.s32 1, %v4040_v13 }
  0x24   : > { %553 = vmatprep.mubr.bf16.mxu0 %v3813_v2  ;;  %3223 = vmatmul.mubr.msk.bf16.gmra.mrb[8].mxu1 %vm442_vm0, %v374_v34 }
  0x25   : > { %3226 = vmatprep.mubr.msk.bf16.mxu1 %vm442_vm0, %v375_v35  ;;  %v4058_v20 = vrot.slane %v393_v15, %v401_v17 }
  0x26   : > { %2938 = vmatpush3.bf16.msra.mxu1 %v3390_v45 }
  0x27   : > { %2939 = vmatprep.subr.bf16.mxu1 %v3392_v47 }
  0x2a   : > { %2940 = vmatpush3.bf16.msra.mxu1 %v3393_v51 }
  0x2b   : > { %2770 = vmatmul.mubr.msk.bf16.gmra.mrb[12].mxu0 %vm442_vm0, %v372_v23  ;;  %2941 = vmatprep.subr.bf16.mxu1 %v3394_v8 }
  0x2c   : > { %563 = vmatprep.mubr.bf16.mxu0 %v3813_v2  ;;  %3227 = vmatmul.mubr.msk.bf16.gmra.mrb[12].mxu1 %vm442_vm0, %v376_v46 }
  0x2d   : > { %3230 = vmatprep.mubr.msk.bf16.mxu1 %vm442_vm0, %v377_v48 }
  0x2e   : > { %2942 = vmatpush3.bf16.msra.mxu1 %v3395_v9 }
  0x2f   : > { %2943 = vmatprep.subr.bf16.mxu1 %v3396_v10 }
  0x32   : > { %2944 = vmatpush3.bf16.msra.mxu1 %v3397_v11 }
  0x33   : > { %2771 = vmatmul.mubr.msk.bf16.gmra.mrb[16].mxu0 %vm442_vm0, %v373_v24  ;;  %3360 = vmatprep.subr.msk.bf16.mxu1 %vm1619_vm1, %v3400_v57 }
  0x34   : > { %573 = vmatprep.mubr.bf16.mxu0 %v3813_v2  ;;  %3231 = vmatmul.mubr.msk.bf16.gmra.mrb[16].mxu1 %vm442_vm0, %v378_v54 }
  0x35   : > { %3234 = vmatprep.mubr.msk.bf16.mxu1 %vm442_vm0, %v379_v55 }
  0x3b   : > { %2772 = vmatmul.mubr.msk.bf16.gmra.mrb[20].mxu0 %vm442_vm0, %v374_v34 }
  0x3c   : > { %583 = vmatprep.mubr.bf16.mxu0 %v3813_v2  ;;  %3235 = vmatmul.mubr.msk.bf16.gmra.mrb[20].mxu1 %vm442_vm0, %v380_v60 }
  0x3d   : > { %3238 = vmatprep.mubr.msk.bf16.mxu1 %vm442_vm0, %v381_v61 }
  0x43   : > { %2773 = vmatmul.mubr.msk.bf16.gmra.mrb[24].mxu0 %vm442_vm0, %v375_v35 }
  0x44   : > { %593 = vmatprep.mubr.bf16.mxu0 %v3813_v2  ;;  %3239 = vmatmul.mubr.msk.bf16.gmra.mrb[24].mxu1 %vm442_vm0, %v382_v3 }
  0x45   : > { %3242 = vmatprep.mubr.msk.bf16.mxu1 %vm442_vm0, %v383_v4 }
  0x4b   : > { %2774 = vmatmul.mubr.msk.bf16.gmra.mrb[28].mxu0 %vm442_vm0, %v376_v46 }
  0x4c   : > { %603 = vmatprep.mubr.bf16.mxu0 %v3813_v2  ;;  %3243 = vmatmul.mubr.msk.bf16.gmra.mrb[28].mxu1 %vm442_vm0, %v384_v7 }
  0x53   : > { %2775 = vmatmul.mubr.msk.bf16.gmra.mrb[32].mxu0 %vm442_vm0, %v377_v48 }
  0x54   : > { %613 = vmatprep.mubr.bf16.mxu0 %v3813_v2 }
  0x5b   : > { %2776 = vmatmul.mubr.msk.bf16.gmra.mrb[36].mxu0 %vm442_vm0, %v378_v54 }
  0x5c   : > { %623 = vmatprep.mubr.bf16.mxu0 %v3813_v2 }
  0x63   : > { %2777 = vmatmul.mubr.msk.bf16.gmra.mrb[40].mxu0 %vm442_vm0, %v379_v55 }
  0x64   : > { %633 = vmatprep.mubr.bf16.mxu0 %v3813_v2 }
  0x6b   : > { %2778 = vmatmul.mubr.msk.bf16.gmra.mrb[44].mxu0 %vm442_vm0, %v380_v60  ;;  %v2837_v60 = vcombine.high %v1543_v56, %v1543_v56 }
  0x6c   : > { %643 = vmatprep.mubr.bf16.mxu0 %v3813_v2 }
  0x6d   : > { %2839 = vmatprep.subr.msk.bf16.mxu0 %vm1619_vm1, %v2837_v60 }
  0x73   : > { %2779 = vmatmul.mubr.msk.bf16.gmra.mrb[48].mxu0 %vm442_vm0, %v381_v61 }
  0x74   : > { %653 = vmatprep.mubr.bf16.mxu0 %v3813_v2 }
  0x7b   : > { %2780 = vmatmul.mubr.msk.bf16.gmra.mrb[52].mxu0 %vm442_vm0, %v382_v3 }
  0x7c   : > { %663 = vmatprep.mubr.bf16.mxu0 %v3813_v2 }
  0x83   : > { %2781 = vmatmul.mubr.msk.bf16.gmra.mrb[56].mxu0 %vm442_vm0, %v383_v4 }
  0x84   : > { %673 = vmatprep.mubr.bf16.mxu0 %v3813_v2 }
  0x8b   : > { %2782 = vmatmul.mubr.msk.bf16.gmra.mrb[60].mxu0 %vm442_vm0, %v384_v7  ;;  %v2836_v7 = vcombine.low %v1543_v56, %v1543_v56 }
  0xe6   : > { %v525_v21 = vpop.f32.mrb[0].mxu0 }
  0xe7   : > { %v526_v22 = vadd.f32 %v525_v21, %v4050_v18  ;;  %v3216_v23 = vpop.f32.mrb[0].mxu1  ;;  %v527_v24 = vpop.f32.mrb[1].mxu0 }
  0xe8   : > { %v727_v25 = vadd.f32 %v3216_v23, %v4054_v19  ;;  %v528_v26 = vadd.f32 %v527_v24, %v4058_v20  ;;  %v718_v27 = vpop.f32.mrb[1].mxu1  ;;  %v529_v28 = vpop.f32.mrb[2].mxu0 }
  0xe9   : > { %3421 = vtanh.f32 %v526_v22  ;;  %v719_v29 = vadd.f32 %v718_v27, %v4054_v19  ;;  %v530_v30 = vadd.f32 %v529_v28, %v4050_v18  ;;  %v3217_v31 = vpop.f32.mrb[2].mxu1  ;;  %v531_v32 = vpop.f32.mrb[3].mxu0 }
  0xea   : > { %3423 = vtanh.f32 %v727_v25  ;;  %v730_v33 = vadd.f32 %v3217_v31, %v4054_v19  ;;  %v721_v34 = vpop.f32.mrb[3].mxu1  ;;  %v532_v35 = vadd.f32 %v531_v32, %v4058_v20  ;;  %v1621_v32 = vsel %vm1619_vm1, %v2836_v7, 0 }
  0xeb   : > { %3425 = vtanh.f32 %v528_v26  ;;  %v722_v36 = vadd.f32 %v721_v34, %v4054_v19 }
  0xec   : > { %3427 = vtanh.f32 %v719_v29  ;;  %v1627_v29 = vsel %vm1619_vm1, %v3400_v57, 0 }
  0xed   : > { %3429 = vtanh.f32 %v530_v30 }
  0xee   : > { %3431 = vtanh.f32 %v730_v33  ;;  %v535_v37 = vpop.f32.mrb[4].mxu0 }
  0xef   : > { %3433 = vtanh.f32 %v532_v35  ;;  %v536_v38 = vadd.f32 %v535_v37, %v4050_v18  ;;  %v537_v39 = vpop.f32.mrb[5].mxu0  ;;  %v3220_v40 = vpop.f32.mrb[4].mxu1 }
  0xf0   : > { %3435 = vtanh.f32 %v722_v36  ;;  %v538_v41 = vadd.f32 %v537_v39, %v4058_v20  ;;  %v539_v42 = vpop.f32.mrb[6].mxu0  ;;  %v734_v43 = vpop.f32.mrb[5].mxu1  ;;  %v743_v46 = vadd.f32 %v3220_v40, %v4054_v19 }
  0xf1   : > { %3437 = vtanh.f32 %v536_v38  ;;  %v540_v44 = vadd.f32 %v539_v42, %v4050_v18  ;;  %v541_v45 = vpop.f32.mrb[7].mxu0  ;;  %v3221_v47 = vpop.f32.mrb[6].mxu1  ;;  %v735_v49 = vadd.f32 %v734_v43, %v4054_v19 }
  0xf2   : > { %3439 = vtanh.f32 %v538_v41  ;;  %v542_v48 = vadd.f32 %v541_v45, %v4058_v20  ;;  %v737_v50 = vpop.f32.mrb[7].mxu1  ;;  %v746_v52 = vadd.f32 %v3221_v47, %v4054_v19 }
  0xf3   : > { %v3422_v51 = vpop.eup %3421  ;;  %3441 = vtanh.f32 %v540_v44  ;;  %v738_v54 = vadd.f32 %v737_v50, %v4054_v19 }
  0xf4   : > { %v3424_v53 = vpop.eup %3423  ;;  %3443 = vtanh.f32 %v542_v48 }
  0xf5   : > { %v3426_v55 = vpop.eup %3425  ;;  %3445 = vtanh.f32 %v743_v46 }
  0xf6   : > { %v3428_v58 = vpop.eup %3427  ;;  %3447 = vtanh.f32 %v735_v49  ;;  %v545_v59 = vpop.f32.mrb[8].mxu0 }
  0xf7   : > { %v3430_v61 = vpop.eup %3429  ;;  %3449 = vtanh.f32 %v746_v52  ;;  %v546_v62 = vadd.f32 %v545_v59, %v4050_v18  ;;  %v547_v63 = vpop.f32.mrb[9].mxu0 }
  0xf8   : > { %v3224_v0 = vpop.f32.mrb[8].mxu1  ;;  %v3432_v1 = vpop.eup %3431  ;;  %3451 = vtanh.f32 %v738_v54  ;;  %v548_v3 = vadd.f32 %v547_v63, %v4058_v20  ;;  %v941_v5 = vpack.c.bf16 %v3430_v61, %v3422_v51 }
  0xf9   : > { %v549_v4 = vpop.f32.mrb[10].mxu0  ;;  %v750_v6 = vpop.f32.mrb[9].mxu1  ;;  %v946_v9 = vpack.c.bf16 %v3432_v1, %v3424_v53  ;;  %3453 = vtanh.f32 %v546_v62  ;;  %v759_v12 = vadd.f32 %v3224_v0, %v4054_v19 }
  0xfa   : > { %v3434_v8 = vpop.eup %3433  ;;  %v550_v10 = vadd.f32 %v549_v4, %v4050_v18  ;;  %v551_v11 = vpop.f32.mrb[11].mxu0  ;;  %3455 = vtanh.f32 %v548_v3  ;;  %v751_v24 = vadd.f32 %v750_v6, %v4054_v19 }
  0xfb   : > { %v3225_v15 = vpop.f32.mrb[10].mxu1  ;;  %v3436_v21 = vpop.eup %3435  ;;  %v552_v22 = vadd.f32 %v551_v11, %v4058_v20  ;;  %v942_v23 = vpack.c.bf16 %v3434_v8, %v3426_v55 }
  0xfc   : > { %v753_v25 = vpop.f32.mrb[11].mxu1  ;;  %v3438_v26 = vpop.eup %3437  ;;  %3457 = vtanh.f32 %v550_v10  ;;  %v943_v27 = vpack.c.bf16 %v3436_v21, %v3428_v58  ;;  %v762_v28 = vadd.f32 %v3225_v15, %v4054_v19 }
  0xfd   : > { %v3440_v30 = vpop.eup %3439  ;;  %3459 = vtanh.f32 %v552_v22  ;;  %1237 = vmatprep.mubr.bf16.mxu1 %v942_v23  ;;  %v754_v31 = vadd.f32 %v753_v25, %v4054_v19 }
  0xfe   : > { %v3442_v33 = vpop.eup %3441  ;;  %3254 = vmatprep.mubr.msk.bf16.mxu0 %vm1156_vm2, %v943_v27  ;;  %1238 = vmatmul.mubr.bf16.vlgmr.msra.gmra.mrb[32].mxu1 %v941_v5  ;;  %3461 = vtanh.f32 %v759_v12  ;;  %v555_v35 = vpop.f32.mrb[12].mxu0 }
  0xff   : > { %v3444_v34 = vpop.eup %3443  ;;  %3255 = vmatmul.mubr.msk.bf16.vlgmr.msra.gmra.mrb[64].mxu0 %vm1156_vm2, %v946_v9  ;;  %v944_v36 = vpack.c.bf16 %v3442_v33, %v3438_v26  ;;  %3463 = vtanh.f32 %v751_v24  ;;  %3287 = vmatpush3.bf16.msra.mxu1 %v1627_v29  ;;  %v556_v38 = vadd.f32 %v555_v35, %v4050_v18  ;;  %v557_v39 = vpop.f32.mrb[13].mxu0 }
 0x100   : > { %v3446_v37 = vpop.eup %3445  ;;  %v945_v40 = vpack.c.bf16 %v3444_v34, %v3440_v30  ;;  %3465 = vtanh.f32 %v762_v28  ;;  %v3228_v41 = vpop.f32.mrb[12].mxu1  ;;  %1630 = vmatpush1.bf16.msra.mxu0 %v1621_v32  ;;  %v558_v43 = vadd.f32 %v557_v39, %v4058_v20 }
 0x101   : > { %v3448_v42 = vpop.eup %3447  ;;  %v559_v44 = vpop.f32.mrb[14].mxu0  ;;  %3467 = vtanh.f32 %v754_v31  ;;  %v775_v49 = vadd.f32 %v3228_v41, %v4054_v19 }
 0x102   : > { %v766_v45 = vpop.f32.mrb[13].mxu1  ;;  %v3450_v46 = vpop.eup %3449  ;;  %3469 = vtanh.f32 %v556_v38  ;;  %v560_v47 = vadd.f32 %v559_v44, %v4050_v18  ;;  %1245 = vmatprep.mubr.bf16.mxu1 %v945_v40 }
 0x103   : > { %v561_v48 = vpop.f32.mrb[15].mxu0  ;;  %v3229_v50 = vpop.f32.mrb[14].mxu1  ;;  %3471 = vtanh.f32 %v558_v43  ;;  %v952_v53 = vpack.c.bf16 %v3450_v46, %v3446_v37  ;;  %v767_v54 = vadd.f32 %v766_v45, %v4054_v19 }
 0x104   : > { %v3452_v51 = vpop.eup %3451  ;;  %v562_v52 = vadd.f32 %v561_v48, %v4058_v20  ;;  %v769_v55 = vpop.f32.mrb[15].mxu1  ;;  %3473 = vtanh.f32 %v560_v47  ;;  %v778_v58 = vadd.f32 %v3229_v50, %v4054_v19 }
 0x105   : > { %v3454_v56 = vpop.eup %3453  ;;  %v949_v57 = vpack.c.bf16 %v3452_v51, %v3448_v42  ;;  %v770_v60 = vadd.f32 %v769_v55, %v4054_v19 }
 0x106   : > { %v3456_v59 = vpop.eup %3455  ;;  %3475 = vtanh.f32 %v562_v52  ;;  %1246 = vmatmul.mubr.bf16.gmra.mrb[36].mxu1 %v944_v36  ;;  %v565_v63 = vpop.f32.mrb[16].mxu0 }
 0x107   : > { %v3458_v61 = vpop.eup %3457  ;;  %3258 = vmatprep.mubr.msk.bf16.mxu0 %vm1156_vm2, %v949_v57  ;;  %3477 = vtanh.f32 %v775_v49  ;;  %v566_v3 = vadd.f32 %v565_v63, %v4050_v18  ;;  %v567_v4 = vpop.f32.mrb[17].mxu0 }
 0x108   : > { %v3460_v62 = vpop.eup %3459  ;;  %3259 = vmatmul.mubr.msk.bf16.gmra.mrb[68].mxu0 %vm1156_vm2, %v952_v53  ;;  %v947_v0 = vpack.c.bf16 %v3458_v61, %v3454_v56  ;;  %3479 = vtanh.f32 %v767_v54  ;;  %v3232_v6 = vpop.f32.mrb[16].mxu1  ;;  %v568_v8 = vadd.f32 %v567_v4, %v4058_v20 }
 0x109   : > { %v3462_v1 = vpop.eup %3461  ;;  %v948_v5 = vpack.c.bf16 %v3460_v62, %v3456_v59  ;;  %3481 = vtanh.f32 %v778_v58  ;;  %v569_v9 = vpop.f32.mrb[18].mxu0  ;;  %v791_v21 = vadd.f32 %v3232_v6, %v4054_v19 }
 0x10a   : > { %v3464_v7 = vpop.eup %3463  ;;  %3483 = vtanh.f32 %v770_v60  ;;  %v782_v10 = vpop.f32.mrb[17].mxu1  ;;  %v570_v12 = vadd.f32 %v569_v9, %v4050_v18 }
 0x10b   : > { %v3466_v11 = vpop.eup %3465  ;;  %3485 = vtanh.f32 %v566_v3  ;;  %v571_v15 = vpop.f32.mrb[19].mxu0  ;;  %1253 = vmatprep.mubr.bf16.mxu1 %v948_v5  ;;  %v783_v26 = vadd.f32 %v782_v10, %v4054_v19 }
 0x10c   : > { %v3233_v22 = vpop.f32.mrb[18].mxu1  ;;  %v3468_v23 = vpop.eup %3467  ;;  %3487 = vtanh.f32 %v568_v8  ;;  %v572_v24 = vadd.f32 %v571_v15, %v4058_v20  ;;  %v958_v25 = vpack.c.bf16 %v3466_v11, %v3462_v1 }
 0x10d   : > { %v785_v27 = vpop.f32.mrb[19].mxu1  ;;  %v3470_v28 = vpop.eup %3469  ;;  %3489 = vtanh.f32 %v570_v12  ;;  %v955_v29 = vpack.c.bf16 %v3468_v23, %v3464_v7  ;;  %v794_v30 = vadd.f32 %v3233_v22, %v4054_v19 }
 0x10e   : > { %v3472_v31 = vpop.eup %3471  ;;  %3491 = vtanh.f32 %v572_v24  ;;  %v786_v32 = vadd.f32 %v785_v27, %v4054_v19  ;;  %1254 = vmatmul.mubr.bf16.gmra.mrb[40].mxu1 %v947_v0  ;;  %v575_v35 = vpop.f32.mrb[20].mxu0 }
 0x10f   : > { %v3474_v33 = vpop.eup %3473  ;;  %3262 = vmatprep.mubr.msk.bf16.mxu0 %vm1156_vm2, %v955_v29  ;;  %3493 = vtanh.f32 %v791_v21  ;;  %v576_v38 = vadd.f32 %v575_v35, %v4050_v18  ;;  %v577_v39 = vpop.f32.mrb[21].mxu0 }
 0x110   : > { %v3476_v34 = vpop.eup %3475  ;;  %v950_v36 = vpack.c.bf16 %v3474_v33, %v3470_v28  ;;  %3263 = vmatmul.mubr.msk.bf16.gmra.mrb[72].mxu0 %vm1156_vm2, %v958_v25  ;;  %3495 = vtanh.f32 %v783_v26  ;;  %v3236_v41 = vpop.f32.mrb[20].mxu1  ;;  %v578_v43 = vadd.f32 %v577_v39, %v4058_v20 }
 0x111   : > { %v3478_v37 = vpop.eup %3477  ;;  %v951_v40 = vpack.c.bf16 %v3476_v34, %v3472_v31  ;;  %3497 = vtanh.f32 %v794_v30  ;;  %v579_v44 = vpop.f32.mrb[22].mxu0  ;;  %v807_v49 = vadd.f32 %v3236_v41, %v4054_v19 }
 0x112   : > { %v3480_v42 = vpop.eup %3479  ;;  %3499 = vtanh.f32 %v786_v32  ;;  %v798_v45 = vpop.f32.mrb[21].mxu1  ;;  %v580_v47 = vadd.f32 %v579_v44, %v4050_v18 }
 0x113   : > { %v3482_v46 = vpop.eup %3481  ;;  %3501 = vtanh.f32 %v576_v38  ;;  %v581_v48 = vpop.f32.mrb[23].mxu0  ;;  %1261 = vmatprep.mubr.bf16.mxu1 %v951_v40  ;;  %v799_v54 = vadd.f32 %v798_v45, %v4054_v19 }
 0x114   : > { %v3237_v50 = vpop.f32.mrb[22].mxu1  ;;  %v3484_v51 = vpop.eup %3483  ;;  %3503 = vtanh.f32 %v578_v43  ;;  %v582_v52 = vadd.f32 %v581_v48, %v4058_v20  ;;  %v964_v53 = vpack.c.bf16 %v3482_v46, %v3478_v37 }
 0x115   : > { %v801_v55 = vpop.f32.mrb[23].mxu1  ;;  %v3486_v56 = vpop.eup %3485  ;;  %3505 = vtanh.f32 %v580_v47  ;;  %v961_v57 = vpack.c.bf16 %v3484_v51, %v3480_v42  ;;  %v810_v58 = vadd.f32 %v3237_v50, %v4054_v19 }
 0x116   : > { %v3488_v59 = vpop.eup %3487  ;;  %3507 = vtanh.f32 %v582_v52  ;;  %v802_v60 = vadd.f32 %v801_v55, %v4054_v19  ;;  %1262 = vmatmul.mubr.bf16.gmra.mrb[44].mxu1 %v950_v36  ;;  %v585_v63 = vpop.f32.mrb[24].mxu0 }
 0x117   : > { %v3490_v61 = vpop.eup %3489  ;;  %3266 = vmatprep.mubr.msk.bf16.mxu0 %vm1156_vm2, %v961_v57  ;;  %3509 = vtanh.f32 %v807_v49  ;;  %v586_v3 = vadd.f32 %v585_v63, %v4050_v18  ;;  %v587_v4 = vpop.f32.mrb[25].mxu0 }
 0x118   : > { %v3492_v62 = vpop.eup %3491  ;;  %v953_v0 = vpack.c.bf16 %v3490_v61, %v3486_v56  ;;  %3267 = vmatmul.mubr.msk.bf16.gmra.mrb[76].mxu0 %vm1156_vm2, %v964_v53  ;;  %3511 = vtanh.f32 %v799_v54  ;;  %v3240_v6 = vpop.f32.mrb[24].mxu1  ;;  %v588_v8 = vadd.f32 %v587_v4, %v4058_v20 }
 0x119   : > { %v3494_v1 = vpop.eup %3493  ;;  %v954_v5 = vpack.c.bf16 %v3492_v62, %v3488_v59  ;;  %3513 = vtanh.f32 %v810_v58  ;;  %v589_v9 = vpop.f32.mrb[26].mxu0  ;;  %v823_v21 = vadd.f32 %v3240_v6, %v4054_v19 }
 0x11a   : > { %v3496_v7 = vpop.eup %3495  ;;  %3515 = vtanh.f32 %v802_v60  ;;  %v814_v10 = vpop.f32.mrb[25].mxu1  ;;  %v590_v12 = vadd.f32 %v589_v9, %v4050_v18 }
 0x11b   : > { %v3498_v11 = vpop.eup %3497  ;;  %3517 = vtanh.f32 %v586_v3  ;;  %v591_v15 = vpop.f32.mrb[27].mxu0  ;;  %1269 = vmatprep.mubr.bf16.mxu1 %v954_v5  ;;  %v815_v26 = vadd.f32 %v814_v10, %v4054_v19 }
 0x11c   : > { %v3241_v22 = vpop.f32.mrb[26].mxu1  ;;  %v3500_v23 = vpop.eup %3499  ;;  %3519 = vtanh.f32 %v588_v8  ;;  %v592_v24 = vadd.f32 %v591_v15, %v4058_v20  ;;  %v970_v25 = vpack.c.bf16 %v3498_v11, %v3494_v1 }
 0x11d   : > { %v817_v27 = vpop.f32.mrb[27].mxu1  ;;  %v3502_v28 = vpop.eup %3501  ;;  %3521 = vtanh.f32 %v590_v12  ;;  %v967_v29 = vpack.c.bf16 %v3500_v23, %v3496_v7  ;;  %v826_v30 = vadd.f32 %v3241_v22, %v4054_v19 }
 0x11e   : > { %v3504_v31 = vpop.eup %3503  ;;  %3523 = vtanh.f32 %v592_v24  ;;  %v818_v32 = vadd.f32 %v817_v27, %v4054_v19  ;;  %1270 = vmatmul.mubr.bf16.gmra.mrb[48].mxu1 %v953_v0  ;;  %v595_v35 = vpop.f32.mrb[28].mxu0 }
 0x11f   : > { %v3506_v33 = vpop.eup %3505  ;;  %3270 = vmatprep.mubr.msk.bf16.mxu0 %vm1156_vm2, %v967_v29  ;;  %3525 = vtanh.f32 %v823_v21  ;;  %v596_v38 = vadd.f32 %v595_v35, %v4050_v18  ;;  %v597_v39 = vpop.f32.mrb[29].mxu0 }
 0x120   : > { %v3508_v34 = vpop.eup %3507  ;;  %v956_v36 = vpack.c.bf16 %v3506_v33, %v3502_v28  ;;  %3271 = vmatmul.mubr.msk.bf16.gmra.mrb[80].mxu0 %vm1156_vm2, %v970_v25  ;;  %3527 = vtanh.f32 %v815_v26  ;;  %v3244_v41 = vpop.f32.mrb[28].mxu1  ;;  %v598_v43 = vadd.f32 %v597_v39, %v4058_v20 }
 0x121   : > { %v3510_v37 = vpop.eup %3509  ;;  %v957_v40 = vpack.c.bf16 %v3508_v34, %v3504_v31  ;;  %3529 = vtanh.f32 %v826_v30  ;;  %v599_v44 = vpop.f32.mrb[30].mxu0  ;;  %v839_v49 = vadd.f32 %v3244_v41, %v4054_v19 }
 0x122   : > { %v3512_v42 = vpop.eup %3511  ;;  %3531 = vtanh.f32 %v818_v32  ;;  %v830_v45 = vpop.f32.mrb[29].mxu1  ;;  %v600_v47 = vadd.f32 %v599_v44, %v4050_v18 }
 0x123   : > { %v3514_v46 = vpop.eup %3513  ;;  %3533 = vtanh.f32 %v596_v38  ;;  %v601_v48 = vpop.f32.mrb[31].mxu0  ;;  %1277 = vmatprep.mubr.bf16.mxu1 %v957_v40  ;;  %v831_v54 = vadd.f32 %v830_v45, %v4054_v19 }
 0x124   : > { %v3245_v50 = vpop.f32.mrb[30].mxu1  ;;  %v3516_v51 = vpop.eup %3515  ;;  %3535 = vtanh.f32 %v598_v43  ;;  %v602_v52 = vadd.f32 %v601_v48, %v4058_v20  ;;  %v976_v53 = vpack.c.bf16 %v3514_v46, %v3510_v37 }
 0x125   : > { %v833_v55 = vpop.f32.mrb[31].mxu1  ;;  %v3518_v56 = vpop.eup %3517  ;;  %3537 = vtanh.f32 %v600_v47  ;;  %v973_v57 = vpack.c.bf16 %v3516_v51, %v3512_v42  ;;  %v842_v58 = vadd.f32 %v3245_v50, %v4054_v19 }
 0x126   : > { %v3520_v59 = vpop.eup %3519  ;;  %3539 = vtanh.f32 %v602_v52  ;;  %v834_v60 = vadd.f32 %v833_v55, %v4054_v19  ;;  %1278 = vmatmul.mubr.bf16.gmra.mrb[52].mxu1 %v956_v36  ;;  %v605_v63 = vpop.f32.mrb[32].mxu0 }
 0x127   : > { %v3522_v61 = vpop.eup %3521  ;;  %3274 = vmatprep.mubr.msk.bf16.mxu0 %vm1156_vm2, %v973_v57  ;;  %3541 = vtanh.f32 %v839_v49  ;;  %v606_v3 = vadd.f32 %v605_v63, %v4050_v18  ;;  %v607_v4 = vpop.f32.mrb[33].mxu0 }
 0x128   : > { %v3524_v62 = vpop.eup %3523  ;;  %v959_v0 = vpack.c.bf16 %v3522_v61, %v3518_v56  ;;  %3275 = vmatmul.mubr.msk.bf16.gmra.mrb[84].mxu0 %vm1156_vm2, %v976_v53  ;;  %3543 = vtanh.f32 %v831_v54  ;;  %v608_v19 = vadd.f32 %v607_v4, %v4058_v20  ;;  %v609_v7 = vpop.f32.mrb[34].mxu0 }
 0x129   : > { %v3526_v1 = vpop.eup %3525  ;;  %v960_v5 = vpack.c.bf16 %v3524_v62, %v3520_v59  ;;  %3545 = vtanh.f32 %v842_v58  ;;  %v610_v9 = vadd.f32 %v609_v7, %v4050_v18  ;;  %v611_v10 = vpop.f32.mrb[35].mxu0 }
 0x12a   : > { %v3528_v6 = vpop.eup %3527  ;;  %3547 = vtanh.f32 %v834_v60  ;;  %v612_v12 = vadd.f32 %v611_v10, %v4058_v20 }
 0x12b   : > { %v3530_v8 = vpop.eup %3529  ;;  %3549 = vtanh.f32 %v606_v3  ;;  %1285 = vmatprep.mubr.bf16.mxu1 %v960_v5 }
 0x12c   : > { %v3532_v11 = vpop.eup %3531  ;;  %3551 = vtanh.f32 %v608_v19  ;;  %v982_v15 = vpack.c.bf16 %v3530_v8, %v3526_v1 }
 0x12d   : > { %v3534_v21 = vpop.eup %3533  ;;  %3553 = vtanh.f32 %v610_v9  ;;  %v979_v22 = vpack.c.bf16 %v3532_v11, %v3528_v6 }
 0x12e   : > { %v3536_v23 = vpop.eup %3535  ;;  %3555 = vtanh.f32 %v612_v12  ;;  %1286 = vmatmul.mubr.bf16.gmra.mrb[56].mxu1 %v959_v0  ;;  %v615_v26 = vpop.f32.mrb[36].mxu0 }
 0x12f   : > { %v3538_v24 = vpop.eup %3537  ;;  %3278 = vmatprep.mubr.msk.bf16.mxu0 %vm1156_vm2, %v979_v22  ;;  %v616_v29 = vadd.f32 %v615_v26, %v4050_v18  ;;  %v617_v30 = vpop.f32.mrb[37].mxu0 }
 0x130   : > { %v3540_v25 = vpop.eup %3539  ;;  %v962_v27 = vpack.c.bf16 %v3538_v24, %v3534_v21  ;;  %3279 = vmatmul.mubr.msk.bf16.gmra.mrb[88].mxu0 %vm1156_vm2, %v982_v15  ;;  %v618_v33 = vadd.f32 %v617_v30, %v4058_v20  ;;  %v619_v34 = vpop.f32.mrb[38].mxu0 }
 0x131   : > { %v3542_v28 = vpop.eup %3541  ;;  %v963_v31 = vpack.c.bf16 %v3540_v25, %v3536_v23  ;;  %3557 = vtanh.f32 %v616_v29  ;;  %v620_v36 = vadd.f32 %v619_v34, %v4050_v18  ;;  %v621_v37 = vpop.f32.mrb[39].mxu0 }
 0x132   : > { %v3544_v32 = vpop.eup %3543  ;;  %3559 = vtanh.f32 %v618_v33  ;;  %v622_v39 = vadd.f32 %v621_v37, %v4058_v20 }
 0x133   : > { %v3546_v35 = vpop.eup %3545  ;;  %1293 = vmatprep.mubr.bf16.mxu1 %v963_v31  ;;  %3561 = vtanh.f32 %v620_v36 }
 0x134   : > { %v3548_v38 = vpop.eup %3547  ;;  %v988_v40 = vpack.c.bf16 %v3546_v35, %v3542_v28  ;;  %3563 = vtanh.f32 %v622_v39 }
 0x135   : > { %v3550_v41 = vpop.eup %3549  ;;  %v985_v42 = vpack.c.bf16 %v3548_v38, %v3544_v32 }
 0x136   : > { %v3552_v43 = vpop.eup %3551  ;;  %1294 = vmatmul.mubr.bf16.gmra.mrb[60].mxu1 %v962_v27  ;;  %v625_v46 = vpop.f32.mrb[40].mxu0 }
 0x137   : > { %v3554_v44 = vpop.eup %3553  ;;  %3282 = vmatprep.mubr.msk.bf16.mxu0 %vm1156_vm2, %v985_v42  ;;  %v626_v48 = vadd.f32 %v625_v46, %v4050_v18  ;;  %v627_v49 = vpop.f32.mrb[41].mxu0 }
 0x138   : > { %v3556_v45 = vpop.eup %3555  ;;  %v965_v47 = vpack.c.bf16 %v3554_v44, %v3550_v41  ;;  %3283 = vmatmul.mubr.msk.bf16.gmra.mrb[92].mxu0 %vm1156_vm2, %v988_v40  ;;  %v628_v51 = vadd.f32 %v627_v49, %v4058_v20  ;;  %v629_v52 = vpop.f32.mrb[42].mxu0 }
 0x139   : > { %v966_v50 = vpack.c.bf16 %v3556_v45, %v3552_v43  ;;  %1661 = vmatprep.mubr.bf16.mxu0 %v3813_v2  ;;  %3565 = vtanh.f32 %v626_v48  ;;  %v630_v53 = vadd.f32 %v629_v52, %v4050_v18  ;;  %v631_v54 = vpop.f32.mrb[43].mxu0 }
 0x13a   : > { %3567 = vtanh.f32 %v628_v51  ;;  %v632_v55 = vadd.f32 %v631_v54, %v4058_v20 }
 0x13b   : > { %1301 = vmatprep.mubr.bf16.mxu1 %v966_v50  ;;  %v3558_v56 = vpop.eup %3557  ;;  %3569 = vtanh.f32 %v630_v53 }
 0x13c   : > { %v3560_v57 = vpop.eup %3559  ;;  %3571 = vtanh.f32 %v632_v55 }
 0x13d   : > { %v3562_v58 = vpop.eup %3561 }
 0x13e   : > { %1302 = vmatmul.mubr.bf16.gmra.mrb[64].mxu1 %v965_v47  ;;  %v3564_v59 = vpop.eup %3563  ;;  %v635_v60 = vpop.f32.mrb[44].mxu0  ;;  %v968_v61 = vpack.c.bf16 %v3562_v58, %v3558_v56 }
 0x13f   : > { %v636_v62 = vadd.f32 %v635_v60, %v4050_v18  ;;  %v637_v63 = vpop.f32.mrb[45].mxu0  ;;  %v969_v0 = vpack.c.bf16 %v3564_v59, %v3560_v57 }
 0x140   : > { %v638_v1 = vadd.f32 %v637_v63, %v4058_v20  ;;  %v639_v3 = vpop.f32.mrb[46].mxu0 }
 0x141   : > { %3573 = vtanh.f32 %v636_v62  ;;  %v640_v4 = vadd.f32 %v639_v3, %v4050_v18  ;;  %v641_v5 = vpop.f32.mrb[47].mxu0  ;;  %1309 = vmatprep.mubr.bf16.mxu1 %v969_v0 }
 0x142   : > { %3575 = vtanh.f32 %v638_v1  ;;  %v642_v6 = vadd.f32 %v641_v5, %v4058_v20 }
 0x143   : > { %v3566_v19 = vpop.eup %3565  ;;  %3577 = vtanh.f32 %v640_v4 }
 0x144   : > { %v3568_v7 = vpop.eup %3567  ;;  %3579 = vtanh.f32 %v642_v6 }
 0x145   : > { %v3570_v8 = vpop.eup %3569 }
 0x146   : > { %1310 = vmatmul.mubr.bf16.gmra.mrb[68].mxu1 %v968_v61  ;;  %v3572_v9 = vpop.eup %3571  ;;  %v645_v10 = vpop.f32.mrb[48].mxu0  ;;  %v971_v11 = vpack.c.bf16 %v3570_v8, %v3566_v19 }
 0x147   : > { %v646_v12 = vadd.f32 %v645_v10, %v4050_v18  ;;  %v647_v15 = vpop.f32.mrb[49].mxu0  ;;  %v972_v21 = vpack.c.bf16 %v3572_v9, %v3568_v7 }
 0x148   : > { %v648_v22 = vadd.f32 %v647_v15, %v4058_v20  ;;  %v649_v23 = vpop.f32.mrb[50].mxu0 }
 0x149   : > { %3581 = vtanh.f32 %v646_v12  ;;  %v650_v24 = vadd.f32 %v649_v23, %v4050_v18  ;;  %v651_v25 = vpop.f32.mrb[51].mxu0  ;;  %1317 = vmatprep.mubr.bf16.mxu1 %v972_v21 }
 0x14a   : > { %3583 = vtanh.f32 %v648_v22  ;;  %v652_v26 = vadd.f32 %v651_v25, %v4058_v20  ;;  %v4186_v25 = vld [vmem:[%s4641_s4] ss:$0 sm:$0xff] }
 0x14b   : > { %v3574_v27 = vpop.eup %3573  ;;  %3585 = vtanh.f32 %v650_v24 }
 0x14c   : > { %v3576_v28 = vpop.eup %3575  ;;  %3587 = vtanh.f32 %v652_v26 }
 0x14d   : > { %v3578_v29 = vpop.eup %3577 }
 0x14e   : > { %1318 = vmatmul.mubr.bf16.gmra.mrb[72].mxu1 %v971_v11  ;;  %v3580_v30 = vpop.eup %3579  ;;  %v655_v31 = vpop.f32.mrb[52].mxu0  ;;  %v974_v32 = vpack.c.bf16 %v3578_v29, %v3574_v27 }
 0x14f   : > { %v656_v33 = vadd.f32 %v655_v31, %v4050_v18  ;;  %v657_v34 = vpop.f32.mrb[53].mxu0  ;;  %v975_v35 = vpack.c.bf16 %v3580_v30, %v3576_v28 }
 0x150   : > { %v658_v36 = vadd.f32 %v657_v34, %v4058_v20  ;;  %v659_v37 = vpop.f32.mrb[54].mxu0  ;;  %v3401_v34 = vld [vmem:[%s4644_s7 + $0x40] sm:$0xff]  }
 0x151   : > { %3589 = vtanh.f32 %v656_v33  ;;  %v660_v38 = vadd.f32 %v659_v37, %v4050_v18  ;;  %v661_v39 = vpop.f32.mrb[55].mxu0  ;;  %1325 = vmatprep.mubr.bf16.mxu1 %v975_v35  ;;  %v3403_v35 = vld [vmem:[%s4644_s7 + $0x80] sm:$0xff]   ;;  %3078 = vmatprep.subr.bf16.mxu1 %v3401_v34 }
 0x152   : > { %3591 = vtanh.f32 %v658_v36  ;;  %v662_v40 = vadd.f32 %v661_v39, %v4058_v20  ;;  %3320 = vmatprep.subr.bf16.mxu0 %v3403_v35 }
 0x153   : > { %v3582_v41 = vpop.eup %3581  ;;  %3593 = vtanh.f32 %v660_v38 }
 0x154   : > { %v3584_v42 = vpop.eup %3583  ;;  %3595 = vtanh.f32 %v662_v40 }
 0x155   : > { %v3586_v43 = vpop.eup %3585 }
 0x156   : > { %1326 = vmatmul.mubr.bf16.gmra.mrb[76].mxu1 %v974_v32  ;;  %v3588_v44 = vpop.eup %3587  ;;  %v665_v45 = vpop.f32.mrb[56].mxu0  ;;  %v977_v46 = vpack.c.bf16 %v3586_v43, %v3582_v41 }
 0x157   : > { %v666_v47 = vadd.f32 %v665_v45, %v4050_v18  ;;  %v667_v48 = vpop.f32.mrb[57].mxu0  ;;  %v978_v49 = vpack.c.bf16 %v3588_v44, %v3584_v42 }
 0x158   : > { %v668_v50 = vadd.f32 %v667_v48, %v4058_v20  ;;  %v669_v51 = vpop.f32.mrb[58].mxu0 }
 0x159   : > { %3597 = vtanh.f32 %v666_v47  ;;  %v670_v52 = vadd.f32 %v669_v51, %v4050_v18  ;;  %v671_v53 = vpop.f32.mrb[59].mxu0  ;;  %1333 = vmatprep.mubr.bf16.mxu1 %v978_v49 }
 0x15a   : > { %3599 = vtanh.f32 %v668_v50  ;;  %v672_v54 = vadd.f32 %v671_v53, %v4058_v20 }
 0x15b   : > { %v3590_v55 = vpop.eup %3589  ;;  %3601 = vtanh.f32 %v670_v52 }
 0x15c   : > { %v3592_v56 = vpop.eup %3591  ;;  %3603 = vtanh.f32 %v672_v54 }
 0x15d   : > { %v3594_v57 = vpop.eup %3593 }
 0x15e   : > { %1334 = vmatmul.mubr.bf16.gmra.mrb[80].mxu1 %v977_v46  ;;  %v3596_v58 = vpop.eup %3595  ;;  %v675_v59 = vpop.f32.mrb[60].mxu0  ;;  %v980_v60 = vpack.c.bf16 %v3594_v57, %v3590_v55  ;;  %v3412_v46 = vld [vmem:[%s4644_s7 + $0x88] sm:$0xff]  }
 0x15f   : > { %v676_v61 = vadd.f32 %v675_v59, %v4050_v18  ;;  %v677_v62 = vpop.f32.mrb[61].mxu0  ;;  %v981_v63 = vpack.c.bf16 %v3596_v58, %v3592_v56  ;;  %v3402_v58 = vld [vmem:[%s4644_s7] sm:$0xff]  }
 0x160   : > { %v678_v0 = vadd.f32 %v677_v62, %v4058_v20  ;;  %v679_v1 = vpop.f32.mrb[62].mxu0 }
 0x161   : > { %3605 = vtanh.f32 %v676_v61  ;;  %v680_v3 = vadd.f32 %v679_v1, %v4050_v18  ;;  %v681_v4 = vpop.f32.mrb[63].mxu0  ;;  %1341 = vmatprep.mubr.bf16.mxu1 %v981_v63  ;;  %v3404_v63 = vld [vmem:[%s4644_s7 + $0x48] sm:$0xff]  }
 0x162   : > { %3607 = vtanh.f32 %v678_v0  ;;  %v682_v5 = vadd.f32 %v681_v4, %v4058_v20 }
 0x163   : > { %v3598_v6 = vpop.eup %3597  ;;  %3609 = vtanh.f32 %v680_v3 }
 0x164   : > { %v3600_v19 = vpop.eup %3599  ;;  %3611 = vtanh.f32 %v682_v5 }
 0x165   : > { %v3602_v7 = vpop.eup %3601 }
 0x166   : > { %1342 = vmatmul.mubr.bf16.gmra.mrb[84].mxu1 %v980_v60  ;;  %v3604_v8 = vpop.eup %3603  ;;  %v983_v9 = vpack.c.bf16 %v3602_v7, %v3598_v6  ;;  %v3405_v6 = vld [vmem:[%s4644_s7 + $0x8] sm:$0xff]  }
 0x167   : > { %v984_v10 = vpack.c.bf16 %v3604_v8, %v3600_v19  ;;  %v3406_v8 = vld [vmem:[%s4644_s7 + $0x50] sm:$0xff]  }
 0x169   : > { %1349 = vmatprep.mubr.bf16.mxu1 %v984_v10 }
 0x16b   : > { %v3606_v11 = vpop.eup %3605 }
 0x16c   : > { %v3608_v12 = vpop.eup %3607 }
 0x16d   : > { %v3610_v15 = vpop.eup %3609 }
 0x16e   : > { %1350 = vmatmul.mubr.bf16.gmra.mrb[88].mxu1 %v983_v9  ;;  %v3612_v18 = vpop.eup %3611  ;;  %v986_v21 = vpack.c.bf16 %v3610_v15, %v3606_v11  ;;  %v3407_v15 = vld [vmem:[%s4644_s7 + $0x10] sm:$0xff]  }
 0x16f   : > { %v987_v22 = vpack.c.bf16 %v3612_v18, %v3608_v12 }
 0x171   : > { %1357 = vmatprep.mubr.bf16.mxu1 %v987_v22 }
 0x176   : > { %1358 = vmatmul.mubr.bf16.gmra.mrb[92].mxu1 %v986_v21 }
 0x1d1   : > { %v2945_v20 = vpop.f32.mrb[32].mxu1 }
 0x1d2   : > { %v3256_v23 = vpop.f32.mrb[64].mxu0  ;;  %v2946_v24 = vpop.f32.mrb[33].mxu1 }
 0x1d3   : > { %v2947_v26 = vadd.f32 %v2946_v24, %v2945_v20  ;;  %v1400_v27 = vpop.f32.mrb[65].mxu0  ;;  %v2948_v28 = vpop.f32.mrb[34].mxu1 }
 0x1d4   : > { %v3257_v29 = vpop.f32.mrb[66].mxu0  ;;  %v2949_v30 = vpop.f32.mrb[35].mxu1 }
 0x1d5   : > { %v1240_v31 = vadd.f32 %v2947_v26, %v4186_v25  ;;  %v2950_v32 = vadd.f32 %v2949_v30, %v2948_v28  ;;  %v1403_v33 = vpop.f32.mrb[67].mxu0  ;;  %v3409_v30 = vld [vmem:[%s4644_s7 + $0x18] sm:$0xff]  }
 0x1d7   : > { %v1401_v36 = vadd.f32 %v1400_v27, %v1240_v31  ;;  %v1243_v37 = vadd.f32 %v2950_v32, %v4186_v25 }
 0x1d9   : > { %v1404_v38 = vadd.f32 %v1403_v33, %v1243_v37  ;;  %v2951_v39 = vpop.f32.mrb[36].mxu1  ;;  %v3410_v33 = vld [vmem:[%s4644_s7 + $0x60] sm:$0xff]  }
 0x1da   : > { %v2952_v40 = vpop.f32.mrb[37].mxu1 }
 0x1db   : > { %v4196_v41 = vpop.f32.mrb[68].mxu0  ;;  %v1527_v42 = vpack.c.bf16 %v1404_v38, %v1401_v36  ;;  %v2953_v43 = vadd.f32 %v2952_v40, %v2951_v39  ;;  %v2954_v44 = vpop.f32.mrb[38].mxu1  ;;  %v3411_v38 = vld [vmem:[%s4644_s7 + $0x20] sm:$0xff]  }
 0x1dc   : > { %v1416_v45 = vpop.f32.mrb[69].mxu0  ;;  %v2955_v47 = vpop.f32.mrb[39].mxu1 }
 0x1dd   : > { %v3261_v48 = vpop.f32.mrb[70].mxu0  ;;  %v1248_v49 = vadd.f32 %v2953_v43, %v4186_v25  ;;  %v2956_v50 = vadd.f32 %v2955_v47, %v2954_v44  ;;  %2840 = vmatmul.mubr.msk.bf16.vlgmr.msra.gmra.mrb[96].mxu0 %vm1570_vm3, %v1527_v42  ;;  %3288 = vmatprep.mubr.msk.bf16.mxu1 %vm1570_vm3, %v1527_v42  ;;  %v3413_v43 = vld [vmem:[%s4644_s7 + $0x68] sm:$0xff]  }
 0x1de   : > { %v1419_v51 = vpop.f32.mrb[71].mxu0  ;;  %1671 = vmatprep.mubr.bf16.mxu0 %v3813_v2  ;;  %3321 = vmatpush3.bf16.msra.mxu0 %v3403_v35 }
 0x1df   : > { %v1409_v52 = vadd.f32 %v3256_v23, %v1248_v49  ;;  %v1251_v53 = vadd.f32 %v2956_v50, %v4186_v25  ;;  %3322 = vmatprep.subr.bf16.mxu0 %v3412_v46  ;;  %v3408_v23 = vld [vmem:[%s4644_s7 + $0x58] sm:$0xff]   ;;  %v3414_v49 = vld [vmem:[%s4644_s7 + $0x28] sm:$0xff]  }
 0x1e1   : > { %v1412_v54 = vadd.f32 %v3257_v29, %v1251_v53  ;;  %v2957_v55 = vpop.f32.mrb[40].mxu1 }
 0x1e2   : > { %v2958_v56 = vpop.f32.mrb[41].mxu1  ;;  %3323 = vmatpush3.bf16.msra.mxu0 %v3412_v46 }
 0x1e3   : > { %v4206_v57 = vpop.f32.mrb[72].mxu0  ;;  %v1528_v59 = vpack.c.bf16 %v1412_v54, %v1409_v52  ;;  %v2959_v60 = vadd.f32 %v2958_v56, %v2957_v55  ;;  %v2960_v61 = vpop.f32.mrb[42].mxu1 }
 0x1e4   : > { %v4211_v62 = vpop.f32.mrb[73].mxu0  ;;  %v2961_v0 = vpop.f32.mrb[43].mxu1 }
 0x1e5   : > { %v4216_v1 = vpop.f32.mrb[74].mxu0  ;;  %v1256_v3 = vadd.f32 %v2959_v60, %v4186_v25  ;;  %v2962_v4 = vadd.f32 %v2961_v0, %v2960_v61  ;;  %2841 = vmatmul.mubr.msk.bf16.gmra.mrb[100].mxu0 %vm1570_vm3, %v1528_v59  ;;  %3289 = vmatmul.mubr.msk.bf16.vlgmr.msra.gmra.mrb[96].mxu1 %vm1570_vm3, %v1528_v59 }
 0x1e6   : > { %v1435_v5 = vpop.f32.mrb[75].mxu0  ;;  %1681 = vmatprep.mubr.bf16.mxu0 %v3813_v2  ;;  %3079 = vmatpush3.bf16.msra.mxu1 %v3402_v58 }
 0x1e7   : > { %v1417_v19 = vadd.f32 %v1416_v45, %v1256_v3  ;;  %v1259_v7 = vadd.f32 %v2962_v4, %v4186_v25  ;;  %3080 = vmatprep.subr.bf16.mxu1 %v3404_v63 }
 0x1e9   : > { %v1420_v9 = vadd.f32 %v1419_v51, %v1259_v7  ;;  %v2963_v10 = vpop.f32.mrb[44].mxu1 }
 0x1ea   : > { %v2964_v11 = vpop.f32.mrb[45].mxu1  ;;  %3081 = vmatpush3.bf16.msra.mxu1 %v3405_v6 }
 0x1eb   : > { %v4229_v12 = vpop.f32.mrb[76].mxu0  ;;  %v1529_v18 = vpack.c.bf16 %v1420_v9, %v1417_v19  ;;  %v2965_v21 = vadd.f32 %v2964_v11, %v2963_v10  ;;  %v2966_v22 = vpop.f32.mrb[46].mxu1  ;;  %3082 = vmatprep.subr.bf16.mxu1 %v3406_v8 }
 0x1ec   : > { %v4234_v20 = vpop.f32.mrb[77].mxu0  ;;  %v2967_v24 = vpop.f32.mrb[47].mxu1 }
 0x1ed   : > { %v4239_v26 = vpop.f32.mrb[78].mxu0  ;;  %v1264_v27 = vadd.f32 %v2965_v21, %v4186_v25  ;;  %v2968_v28 = vadd.f32 %v2967_v24, %v2966_v22  ;;  %2842 = vmatmul.mubr.msk.bf16.gmra.mrb[104].mxu0 %vm1570_vm3, %v1529_v18  ;;  %3292 = vmatprep.mubr.msk.bf16.mxu1 %vm1570_vm3, %v1529_v18 }
 0x1ee   : > { %v4244_v29 = vpop.f32.mrb[79].mxu0  ;;  %1691 = vmatprep.mubr.bf16.mxu0 %v3813_v2  ;;  %3083 = vmatpush3.bf16.msra.mxu1 %v3407_v15 }
 0x1ef   : > { %v1425_v31 = vadd.f32 %v4196_v41, %v1264_v27  ;;  %v1267_v32 = vadd.f32 %v2968_v28, %v4186_v25  ;;  %3084 = vmatprep.subr.bf16.mxu1 %v3408_v23 }
 0x1f1   : > { %v1428_v34 = vadd.f32 %v3261_v48, %v1267_v32  ;;  %v2969_v35 = vpop.f32.mrb[48].mxu1 }
 0x1f2   : > { %v2970_v36 = vpop.f32.mrb[49].mxu1  ;;  %3085 = vmatpush3.bf16.msra.mxu1 %v3409_v30 }
 0x1f3   : > { %v4255_v37 = vpop.f32.mrb[80].mxu0  ;;  %v1530_v39 = vpack.c.bf16 %v1428_v34, %v1425_v31  ;;  %v2971_v40 = vadd.f32 %v2970_v36, %v2969_v35  ;;  %v2972_v41 = vpop.f32.mrb[50].mxu1  ;;  %3086 = vmatprep.subr.bf16.mxu1 %v3410_v33 }
 0x1f4   : > { %v4260_v42 = vpop.f32.mrb[81].mxu0  ;;  %v2973_v44 = vpop.f32.mrb[51].mxu1 }
 0x1f5   : > { %v4265_v45 = vpop.f32.mrb[82].mxu0  ;;  %v1272_v46 = vadd.f32 %v2971_v40, %v4186_v25  ;;  %v2974_v47 = vadd.f32 %v2973_v44, %v2972_v41  ;;  %2843 = vmatmul.mubr.msk.bf16.gmra.mrb[108].mxu0 %vm1570_vm3, %v1530_v39  ;;  %3293 = vmatmul.mubr.msk.bf16.gmra.mrb[100].mxu1 %vm1570_vm3, %v1530_v39 }
 0x1f6   : > { %v4270_v48 = vpop.f32.mrb[83].mxu0  ;;  %1701 = vmatprep.mubr.bf16.mxu0 %v3813_v2  ;;  %3087 = vmatpush3.bf16.msra.mxu1 %v3411_v38 }
 0x1f7   : > { %v1433_v50 = vadd.f32 %v4211_v62, %v1272_v46  ;;  %v1275_v51 = vadd.f32 %v2974_v47, %v4186_v25  ;;  %3088 = vmatprep.subr.bf16.mxu1 %v3413_v43 }
 0x1f9   : > { %v1436_v52 = vadd.f32 %v1435_v5, %v1275_v51  ;;  %v2975_v53 = vpop.f32.mrb[52].mxu1 }
 0x1fa   : > { %v2976_v54 = vpop.f32.mrb[53].mxu1  ;;  %3089 = vmatpush3.bf16.msra.mxu1 %v3414_v49 }
 0x1fb   : > { %v4278_v55 = vpop.f32.mrb[84].mxu0  ;;  %v1531_v56 = vpack.c.bf16 %v1436_v52, %v1433_v50  ;;  %v2977_v58 = vadd.f32 %v2976_v54, %v2975_v53  ;;  %v2978_v59 = vpop.f32.mrb[54].mxu1 }
 0x1fc   : > { %v4280_v60 = vpop.f32.mrb[85].mxu0  ;;  %v2979_v61 = vpop.f32.mrb[55].mxu1 }
 0x1fd   : > { %v4282_v63 = vpop.f32.mrb[86].mxu0  ;;  %v1280_v0 = vadd.f32 %v2977_v58, %v4186_v25  ;;  %v2980_v62 = vadd.f32 %v2979_v61, %v2978_v59  ;;  %2844 = vmatmul.mubr.msk.bf16.gmra.mrb[112].mxu0 %vm1570_vm3, %v1531_v56  ;;  %3296 = vmatprep.mubr.msk.bf16.mxu1 %vm1570_vm3, %v1531_v56 }
 0x1fe   : > { %v4287_v3 = vpop.f32.mrb[87].mxu0  ;;  %1711 = vmatprep.mubr.bf16.mxu0 %v3813_v2 }
 0x1ff   : > { %v1441_v4 = vadd.f32 %v4206_v57, %v1280_v0  ;;  %v1283_v5 = vadd.f32 %v2980_v62, %v4186_v25 }
 0x201   : > { %v1444_v6 = vadd.f32 %v4216_v1, %v1283_v5  ;;  %v2981_v19 = vpop.f32.mrb[56].mxu1 }
 0x202   : > { %v2982_v7 = vpop.f32.mrb[57].mxu1 }
 0x203   : > { %v4293_v8 = vpop.f32.mrb[88].mxu0  ;;  %v1532_v9 = vpack.c.bf16 %v1444_v6, %v1441_v4  ;;  %v2983_v10 = vadd.f32 %v2982_v7, %v2981_v19  ;;  %v2984_v11 = vpop.f32.mrb[58].mxu1 }
 0x204   : > { %v4295_v15 = vpop.f32.mrb[89].mxu0  ;;  %v2985_v18 = vpop.f32.mrb[59].mxu1 }
 0x205   : > { %v4297_v21 = vpop.f32.mrb[90].mxu0  ;;  %v1288_v22 = vadd.f32 %v2983_v10, %v4186_v25  ;;  %v2986_v23 = vadd.f32 %v2985_v18, %v2984_v11  ;;  %2845 = vmatmul.mubr.msk.bf16.gmra.mrb[116].mxu0 %vm1570_vm3, %v1532_v9  ;;  %3297 = vmatmul.mubr.msk.bf16.gmra.mrb[104].mxu1 %vm1570_vm3, %v1532_v9 }
 0x206   : > { %v4302_v57 = vpop.f32.mrb[91].mxu0  ;;  %1721 = vmatprep.mubr.bf16.mxu0 %v3813_v2 }
 0x207   : > { %v1449_v1 = vadd.f32 %v4234_v20, %v1288_v22  ;;  %v1291_v24 = vadd.f32 %v2986_v23, %v4186_v25 }
 0x209   : > { %v1452_v27 = vadd.f32 %v4244_v29, %v1291_v24  ;;  %v2987_v28 = vpop.f32.mrb[60].mxu1 }
 0x20a   : > { %v2988_v30 = vpop.f32.mrb[61].mxu1 }
 0x20b   : > { %v4308_v31 = vpop.f32.mrb[92].mxu0  ;;  %v1533_v32 = vpack.c.bf16 %v1452_v27, %v1449_v1  ;;  %v2989_v33 = vadd.f32 %v2988_v30, %v2987_v28  ;;  %v2990_v34 = vpop.f32.mrb[62].mxu1 }
 0x20c   : > { %v4310_v35 = vpop.f32.mrb[93].mxu0  ;;  %v2991_v36 = vpop.f32.mrb[63].mxu1 }
 0x20d   : > { %v4312_v38 = vpop.f32.mrb[94].mxu0  ;;  %v1296_v39 = vadd.f32 %v2989_v33, %v4186_v25  ;;  %v2992_v40 = vadd.f32 %v2991_v36, %v2990_v34  ;;  %2846 = vmatmul.mubr.msk.bf16.gmra.mrb[120].mxu0 %vm1570_vm3, %v1533_v32  ;;  %3300 = vmatprep.mubr.msk.bf16.mxu1 %vm1570_vm3, %v1533_v32 }
 0x20e   : > { %v4317_v20 = vpop.f32.mrb[95].mxu0  ;;  %1731 = vmatprep.mubr.bf16.mxu0 %v3813_v2 }
 0x20f   : > { %v1457_v29 = vadd.f32 %v4229_v12, %v1296_v39  ;;  %v1299_v41 = vadd.f32 %v2992_v40, %v4186_v25 }
 0x211   : > { %v1460_v43 = vadd.f32 %v4239_v26, %v1299_v41  ;;  %v2993_v44 = vpop.f32.mrb[64].mxu1 }
 0x212   : > { %v2994_v46 = vpop.f32.mrb[65].mxu1 }
 0x213   : > { %v1534_v47 = vpack.c.bf16 %v1460_v43, %v1457_v29  ;;  %v2995_v49 = vadd.f32 %v2994_v46, %v2993_v44  ;;  %v2996_v50 = vpop.f32.mrb[66].mxu1 }
 0x214   : > { %v2997_v51 = vpop.f32.mrb[67].mxu1 }
 0x215   : > { %v1304_v52 = vadd.f32 %v2995_v49, %v4186_v25  ;;  %v2998_v53 = vadd.f32 %v2997_v51, %v2996_v50  ;;  %2847 = vmatmul.mubr.msk.bf16.gmra.mrb[124].mxu0 %vm1570_vm3, %v1534_v47  ;;  %3301 = vmatmul.mubr.msk.bf16.gmra.mrb[108].mxu1 %vm1570_vm3, %v1534_v47 }
 0x216   : > { %1741 = vmatprep.mubr.bf16.mxu0 %v3813_v2 }
 0x217   : > { %v1465_v12 = vadd.f32 %v4260_v42, %v1304_v52  ;;  %v1307_v54 = vadd.f32 %v2998_v53, %v4186_v25 }
 0x219   : > { %v1468_v26 = vadd.f32 %v4270_v48, %v1307_v54  ;;  %v2999_v56 = vpop.f32.mrb[68].mxu1 }
 0x21a   : > { %v3000_v58 = vpop.f32.mrb[69].mxu1 }
 0x21b   : > { %v1535_v59 = vpack.c.bf16 %v1468_v26, %v1465_v12  ;;  %v3001_v61 = vadd.f32 %v3000_v58, %v2999_v56  ;;  %v3002_v0 = vpop.f32.mrb[70].mxu1 }
 0x21c   : > { %v3003_v62 = vpop.f32.mrb[71].mxu1 }
 0x21d   : > { %v1312_v4 = vadd.f32 %v3001_v61, %v4186_v25  ;;  %v3004_v5 = vadd.f32 %v3003_v62, %v3002_v0  ;;  %2848 = vmatmul.mubr.msk.bf16.gmra.mrb[128].mxu0 %vm1570_vm3, %v1535_v59  ;;  %3304 = vmatprep.mubr.msk.bf16.mxu1 %vm1570_vm3, %v1535_v59 }
 0x21e   : > { %1751 = vmatprep.mubr.bf16.mxu0 %v3813_v2 }
 0x21f   : > { %v1473_v42 = vadd.f32 %v4255_v37, %v1312_v4  ;;  %v1315_v6 = vadd.f32 %v3004_v5, %v4186_v25  ;;  %v3417_v5 = vld [vmem:[%s4644_s7 + $0x78] sm:$0xff]  }
 0x221   : > { %v1476_v48 = vadd.f32 %v4265_v45, %v1315_v6  ;;  %v3005_v19 = vpop.f32.mrb[72].mxu1 }
 0x222   : > { %v3006_v7 = vpop.f32.mrb[73].mxu1 }
 0x223   : > { %v1536_v9 = vpack.c.bf16 %v1476_v48, %v1473_v42  ;;  %v3007_v10 = vadd.f32 %v3006_v7, %v3005_v19  ;;  %v3008_v11 = vpop.f32.mrb[74].mxu1  ;;  %v3418_v19 = vld [vmem:[%s4644_s7 + $0x38] sm:$0xff]  }
 0x224   : > { %v3009_v18 = vpop.f32.mrb[75].mxu1 }
 0x225   : > { %v1320_v22 = vadd.f32 %v3007_v10, %v4186_v25  ;;  %v3010_v23 = vadd.f32 %v3009_v18, %v3008_v11  ;;  %2849 = vmatmul.mubr.msk.bf16.gmra.mrb[132].mxu0 %vm1570_vm3, %v1536_v9  ;;  %3305 = vmatmul.mubr.msk.bf16.gmra.mrb[112].mxu1 %vm1570_vm3, %v1536_v9 }
 0x226   : > { %1761 = vmatprep.mubr.bf16.mxu0 %v3813_v2 }
 0x227   : > { %v1481_v37 = vadd.f32 %v4280_v60, %v1320_v22  ;;  %v1323_v1 = vadd.f32 %v3010_v23, %v4186_v25 }
 0x229   : > { %v1484_v45 = vadd.f32 %v4287_v3, %v1323_v1  ;;  %v3011_v24 = vpop.f32.mrb[76].mxu1 }
 0x22a   : > { %v3012_v27 = vpop.f32.mrb[77].mxu1 }
 0x22b   : > { %v1537_v28 = vpack.c.bf16 %v1484_v45, %v1481_v37  ;;  %v3013_v30 = vadd.f32 %v3012_v27, %v3011_v24  ;;  %v3014_v32 = vpop.f32.mrb[78].mxu1  ;;  %v3420_v37 = vld [vmem:[%s4644_s7 + $0x98] sm:$0xff]  }
 0x22c   : > { %v3015_v33 = vpop.f32.mrb[79].mxu1 }
 0x22d   : > { %v1328_v34 = vadd.f32 %v3013_v30, %v4186_v25  ;;  %v3016_v36 = vadd.f32 %v3015_v33, %v3014_v32  ;;  %2850 = vmatmul.mubr.msk.bf16.gmra.mrb[136].mxu0 %vm1570_vm3, %v1537_v28  ;;  %3308 = vmatprep.mubr.msk.bf16.mxu1 %vm1570_vm3, %v1537_v28 }
 0x22e   : > { %1771 = vmatprep.mubr.bf16.mxu0 %v3813_v2 }
 0x22f   : > { %v1489_v60 = vadd.f32 %v4278_v55, %v1328_v34  ;;  %v1331_v39 = vadd.f32 %v3016_v36, %v4186_v25  ;;  %v3415_v55 = vld [vmem:[%s4644_s7 + $0x70] sm:$0xff]   ;;  %v1545_v34 = vld [vmem:[%s4643_s6] sm:$0x7] }
 0x230   : > { %3090 = vmatprep.subr.bf16.mxu1 %v3415_v55  ;;  %v4404_v36 = vrot.slane %v1545_v34, %v397_v14  ;;  %v4416_v14 = vrot.slane %v1545_v34, %v405_v16 }
 0x231   : > { %v1492_v3 = vadd.f32 %v4282_v63, %v1331_v39  ;;  %v3017_v40 = vpop.f32.mrb[80].mxu1  ;;  %v3416_v63 = vld [vmem:[%s4644_s7 + $0x30] sm:$0xff]  }
 0x232   : > { %v3018_v29 = vpop.f32.mrb[81].mxu1  ;;  %3091 = vmatpush3.bf16.msra.mxu1 %v3416_v63 }
 0x233   : > { %v1538_v41 = vpack.c.bf16 %v1492_v3, %v1489_v60  ;;  %v3019_v43 = vadd.f32 %v3018_v29, %v3017_v40  ;;  %v3020_v44 = vpop.f32.mrb[82].mxu1  ;;  %3092 = vmatprep.subr.bf16.mxu1 %v3417_v5 }
 0x234   : > { %v3021_v46 = vpop.f32.mrb[83].mxu1 }
 0x235   : > { %v1336_v47 = vadd.f32 %v3019_v43, %v4186_v25  ;;  %v3022_v49 = vadd.f32 %v3021_v46, %v3020_v44  ;;  %2851 = vmatmul.mubr.msk.bf16.gmra.mrb[140].mxu0 %vm1570_vm3, %v1538_v41  ;;  %3309 = vmatmul.mubr.msk.bf16.gmra.mrb[116].mxu1 %vm1570_vm3, %v1538_v41 }
 0x236   : > { %1781 = vmatprep.mubr.bf16.mxu0 %v3813_v2  ;;  %3093 = vmatpush3.bf16.msra.mxu1 %v3418_v19 }
 0x237   : > { %v1497_v50 = vadd.f32 %v4295_v15, %v1336_v47  ;;  %v1339_v51 = vadd.f32 %v3022_v49, %v4186_v25 }
 0x239   : > { %v1500_v52 = vadd.f32 %v4302_v57, %v1339_v51  ;;  %v3023_v53 = vpop.f32.mrb[84].mxu1 }
 0x23a   : > { %v3024_v12 = vpop.f32.mrb[85].mxu1 }
 0x23b   : > { %v1539_v54 = vpack.c.bf16 %v1500_v52, %v1497_v50  ;;  %v3025_v26 = vadd.f32 %v3024_v12, %v3023_v53  ;;  %v3026_v56 = vpop.f32.mrb[86].mxu1 }
 0x23c   : > { %v3027_v58 = vpop.f32.mrb[87].mxu1 }
 0x23d   : > { %v1344_v59 = vadd.f32 %v3025_v26, %v4186_v25  ;;  %v3028_v61 = vadd.f32 %v3027_v58, %v3026_v56  ;;  %2852 = vmatmul.mubr.msk.bf16.gmra.mrb[144].mxu0 %vm1570_vm3, %v1539_v54  ;;  %3312 = vmatprep.mubr.msk.bf16.mxu1 %vm1570_vm3, %v1539_v54 }
 0x23e   : > { %1791 = vmatprep.mubr.bf16.mxu0 %v3813_v2 }
 0x23f   : > { %v1505_v15 = vadd.f32 %v4293_v8, %v1344_v59  ;;  %v1347_v57 = vadd.f32 %v3028_v61, %v4186_v25 }
 0x241   : > { %v1508_v0 = vadd.f32 %v4297_v21, %v1347_v57  ;;  %v3029_v62 = vpop.f32.mrb[88].mxu1  ;;  %v3419_v21 = vld [vmem:[%s4644_s7 + $0x90] sm:$0xff]  }
 0x242   : > { %v3030_v4 = vpop.f32.mrb[89].mxu1  ;;  %3324 = vmatprep.subr.bf16.mxu0 %v3419_v21 }
 0x243   : > { %v1540_v42 = vpack.c.bf16 %v1508_v0, %v1505_v15  ;;  %v3031_v6 = vadd.f32 %v3030_v4, %v3029_v62  ;;  %v3032_v48 = vpop.f32.mrb[90].mxu1  ;;  %3325 = vmatpush3.bf16.msra.mxu0 %v3419_v21 }
 0x244   : > { %v3033_v7 = vpop.f32.mrb[91].mxu1  ;;  %3326 = vmatprep.subr.bf16.mxu0 %v3420_v37 }
 0x245   : > { %v1352_v8 = vadd.f32 %v3031_v6, %v4186_v25  ;;  %v3034_v9 = vadd.f32 %v3033_v7, %v3032_v48  ;;  %2853 = vmatmul.mubr.msk.bf16.gmra.mrb[148].mxu0 %vm1570_vm3, %v1540_v42  ;;  %3313 = vmatmul.mubr.msk.bf16.gmra.mrb[120].mxu1 %vm1570_vm3, %v1540_v42 }
 0x246   : > { %1801 = vmatprep.mubr.bf16.mxu0 %v3813_v2 }
 0x247   : > { %v1513_v10 = vadd.f32 %v4310_v35, %v1352_v8  ;;  %v1355_v11 = vadd.f32 %v3034_v9, %v4186_v25  ;;  %3327 = vmatpush3.bf16.msra.mxu0 %v3420_v37 }
 0x249   : > { %v1516_v18 = vadd.f32 %v4317_v20, %v1355_v11  ;;  %v3035_v22 = vpop.f32.mrb[92].mxu1 }
 0x24a   : > { %v3036_v23 = vpop.f32.mrb[93].mxu1 }
 0x24b   : > { %v1541_v1 = vpack.c.bf16 %v1516_v18, %v1513_v10  ;;  %v3037_v45 = vadd.f32 %v3036_v23, %v3035_v22  ;;  %v3038_v24 = vpop.f32.mrb[94].mxu1 }
 0x24c   : > { %v3039_v27 = vpop.f32.mrb[95].mxu1 }
 0x24d   : > { %v1360_v28 = vadd.f32 %v3037_v45, %v4186_v25  ;;  %v3040_v35 = vadd.f32 %v3039_v27, %v3038_v24  ;;  %2854 = vmatmul.mubr.msk.bf16.gmra.mrb[152].mxu0 %vm1570_vm3, %v1541_v1  ;;  %3316 = vmatprep.mubr.msk.bf16.mxu1 %vm1570_vm3, %v1541_v1 }
 0x24e   : > { %1811 = vmatprep.mubr.bf16.mxu0 %v3813_v2  ;;  %v4408_v2 = vrot.slane %v1545_v34, %v401_v17 }
 0x24f   : > { %v1521_v20 = vadd.f32 %v4308_v31, %v1360_v28  ;;  %v1363_v30 = vadd.f32 %v3040_v35, %v4186_v25 }
 0x251   : > { %v1524_v32 = vadd.f32 %v4312_v38, %v1363_v30 }
 0x253   : > { %v1542_v33 = vpack.c.bf16 %v1524_v32, %v1521_v20 }
 0x255   : > { %2855 = vmatmul.mubr.msk.bf16.gmra.mrb[156].mxu0 %vm1570_vm3, %v1542_v33  ;;  %3317 = vmatmul.mubr.msk.bf16.gmra.mrb[124].mxu1 %vm1570_vm3, %v1542_v33 }
 0x2b0   : > { %v1663_v25 = vpop.f32.mrb[96].mxu0 }
 0x2b1   : > { %v1664_v31 = vadd.f32 %v1663_v25, %v4404_v36  ;;  %v1665_v38 = vpop.f32.mrb[97].mxu0 }
 0x2b2   : > { %v1666_v60 = vadd.f32 %v1665_v38, %v4408_v2  ;;  %v1667_v39 = vpop.f32.mrb[98].mxu0 }
 0x2b3   : > { %3613 = vtanh.f32 %v1664_v31  ;;  %v1668_v3 = vadd.f32 %v1667_v39, %v4404_v36  ;;  %v1669_v40 = vpop.f32.mrb[99].mxu0 }
 0x2b4   : > { %3615 = vtanh.f32 %v1666_v60  ;;  %v1670_v29 = vadd.f32 %v1669_v40, %v4408_v2 }
 0x2b5   : > { %3617 = vtanh.f32 %v1668_v3 }
 0x2b6   : > { %3619 = vtanh.f32 %v1670_v29 }
 0x2b8   : > { %v1673_v17 = vpop.f32.mrb[100].mxu0  ;;  %v3290_v41 = vpop.f32.mrb[96].mxu1 }
 0x2b9   : > { %v1674_v43 = vadd.f32 %v1673_v17, %v4404_v36  ;;  %v1865_v44 = vadd.f32 %v3290_v41, %v4416_v14  ;;  %v1675_v46 = vpop.f32.mrb[101].mxu0  ;;  %v1856_v47 = vpop.f32.mrb[97].mxu1 }
 0x2ba   : > { %v1676_v49 = vadd.f32 %v1675_v46, %v4408_v2  ;;  %v1857_v55 = vadd.f32 %v1856_v47, %v4416_v14  ;;  %v1677_v63 = vpop.f32.mrb[102].mxu0  ;;  %v3291_v50 = vpop.f32.mrb[98].mxu1 }
 0x2bb   : > { %3621 = vtanh.f32 %v1674_v43  ;;  %v1678_v13 = vadd.f32 %v1677_v63, %v4404_v36  ;;  %v1679_v16 = vpop.f32.mrb[103].mxu0  ;;  %v1859_v51 = vpop.f32.mrb[99].mxu1  ;;  %v1868_v52 = vadd.f32 %v3291_v50, %v4416_v14 }
 0x2bc   : > { %3623 = vtanh.f32 %v1865_v44  ;;  %v1680_v12 = vadd.f32 %v1679_v16, %v4408_v2  ;;  %v1860_v26 = vadd.f32 %v1859_v51, %v4416_v14 }
 0x2bd   : > { %v3614_v53 = vpop.eup %3613  ;;  %3625 = vtanh.f32 %v1676_v49 }
 0x2be   : > { %v3616_v54 = vpop.eup %3615  ;;  %3627 = vtanh.f32 %v1857_v55 }
 0x2bf   : > { %v3618_v56 = vpop.eup %3617  ;;  %3629 = vtanh.f32 %v1678_v13 }
 0x2c0   : > { %v3620_v58 = vpop.eup %3619  ;;  %3631 = vtanh.f32 %v1868_v52  ;;  %v1683_v59 = vpop.f32.mrb[104].mxu0  ;;  %v2079_v61 = vpack.c.bf16 %v3618_v56, %v3614_v53 }
 0x2c1   : > { %3633 = vtanh.f32 %v1680_v12  ;;  %v1684_v15 = vadd.f32 %v1683_v59, %v4404_v36  ;;  %v1685_v57 = vpop.f32.mrb[105].mxu0  ;;  %v2080_v0 = vpack.c.bf16 %v3620_v58, %v3616_v54 }
 0x2c2   : > { %3635 = vtanh.f32 %v1860_v26  ;;  %v1686_v62 = vadd.f32 %v1685_v57, %v4408_v2  ;;  %v1687_v4 = vpop.f32.mrb[106].mxu0 }
 0x2c3   : > { %3637 = vtanh.f32 %v1684_v15  ;;  %v1688_v5 = vadd.f32 %v1687_v4, %v4404_v36  ;;  %v1689_v42 = vpop.f32.mrb[107].mxu0  ;;  %2374 = vmatprep.mubr.bf16.mxu1 %v2080_v0 }
 0x2c4   : > { %3639 = vtanh.f32 %v1686_v62  ;;  %v1690_v6 = vadd.f32 %v1689_v42, %v4408_v2  ;;  %2375 = vmatmul.mubr.bf16.vlgmr.msra.gmra.mrb[128].mxu1 %v2079_v61 }
 0x2c5   : > { %v3622_v48 = vpop.eup %3621  ;;  %3641 = vtanh.f32 %v1688_v5 }
 0x2c6   : > { %v3624_v19 = vpop.eup %3623  ;;  %3643 = vtanh.f32 %v1690_v6 }
 0x2c7   : > { %v3626_v7 = vpop.eup %3625 }
 0x2c8   : > { %v3628_v8 = vpop.eup %3627  ;;  %v1693_v9 = vpop.f32.mrb[108].mxu0 }
 0x2c9   : > { %v3294_v21 = vpop.f32.mrb[100].mxu1  ;;  %v3630_v10 = vpop.eup %3629  ;;  %v1694_v11 = vadd.f32 %v1693_v9, %v4404_v36 }
 0x2ca   : > { %v1881_v18 = vadd.f32 %v3294_v21, %v4416_v14  ;;  %v1695_v22 = vpop.f32.mrb[109].mxu0  ;;  %v1872_v23 = vpop.f32.mrb[101].mxu1  ;;  %v2082_v28 = vpack.c.bf16 %v3630_v10, %v3622_v48 }
 0x2cb   : > { %v3632_v37 = vpop.eup %3631  ;;  %v1696_v1 = vadd.f32 %v1695_v22, %v4408_v2  ;;  %v1873_v45 = vadd.f32 %v1872_v23, %v4416_v14  ;;  %v1697_v24 = vpop.f32.mrb[110].mxu0  ;;  %3645 = vtanh.f32 %v1694_v11 }
 0x2cc   : > { %v3295_v27 = vpop.f32.mrb[102].mxu1  ;;  %v3634_v35 = vpop.eup %3633  ;;  %v2084_v20 = vpack.c.bf16 %v3632_v37, %v3624_v19  ;;  %v1698_v30 = vadd.f32 %v1697_v24, %v4404_v36  ;;  %3647 = vtanh.f32 %v1881_v18 }
 0x2cd   : > { %v1699_v32 = vpop.f32.mrb[111].mxu0  ;;  %v1875_v33 = vpop.f32.mrb[103].mxu1  ;;  %v1884_v25 = vadd.f32 %v3295_v27, %v4416_v14  ;;  %v2083_v31 = vpack.c.bf16 %v3634_v35, %v3626_v7  ;;  %3649 = vtanh.f32 %v1696_v1 }
 0x2ce   : > { %v3636_v34 = vpop.eup %3635  ;;  %v1700_v60 = vadd.f32 %v1699_v32, %v4408_v2  ;;  %3651 = vtanh.f32 %v1873_v45  ;;  %v1876_v40 = vadd.f32 %v1875_v33, %v4416_v14 }
 0x2cf   : > { %v3638_v38 = vpop.eup %3637  ;;  %v2081_v39 = vpack.c.bf16 %v3636_v34, %v3628_v8  ;;  %2382 = vmatprep.mubr.bf16.mxu1 %v2083_v31  ;;  %3653 = vtanh.f32 %v1698_v30 }
 0x2d0   : > { %v3640_v3 = vpop.eup %3639  ;;  %2383 = vmatmul.mubr.bf16.gmra.mrb[132].mxu1 %v2082_v28  ;;  %3655 = vtanh.f32 %v1884_v25  ;;  %v1703_v41 = vpop.f32.mrb[112].mxu0 }
 0x2d1   : > { %v3642_v29 = vpop.eup %3641  ;;  %3328 = vmatprep.mubr.msk.bf16.mxu0 %vm1156_vm2, %v2081_v39  ;;  %3657 = vtanh.f32 %v1700_v60  ;;  %v1704_v44 = vadd.f32 %v1703_v41, %v4404_v36  ;;  %v1705_v46 = vpop.f32.mrb[113].mxu0 }
 0x2d2   : > { %v3644_v17 = vpop.eup %3643  ;;  %3329 = vmatmul.mubr.msk.bf16.vlgmr.msra.gmra.mrb[160].mxu0 %vm1156_vm2, %v2084_v20  ;;  %v2085_v43 = vpack.c.bf16 %v3642_v29, %v3638_v38  ;;  %3659 = vtanh.f32 %v1876_v40  ;;  %v1706_v49 = vadd.f32 %v1705_v46, %v4408_v2  ;;  %v1707_v55 = vpop.f32.mrb[114].mxu0 }
 0x2d3   : > { %v2086_v47 = vpack.c.bf16 %v3644_v17, %v3640_v3  ;;  %3661 = vtanh.f32 %v1704_v44  ;;  %v1708_v63 = vadd.f32 %v1707_v55, %v4404_v36  ;;  %v1709_v50 = vpop.f32.mrb[115].mxu0 }
 0x2d4   : > { %3663 = vtanh.f32 %v1706_v49  ;;  %v1710_v13 = vadd.f32 %v1709_v50, %v4408_v2 }
 0x2d5   : > { %2390 = vmatprep.mubr.bf16.mxu1 %v2086_v47  ;;  %v3646_v16 = vpop.eup %3645  ;;  %3665 = vtanh.f32 %v1708_v63 }
 0x2d6   : > { %v3648_v51 = vpop.eup %3647  ;;  %3667 = vtanh.f32 %v1710_v13 }
 0x2d7   : > { %v3650_v52 = vpop.eup %3649 }
 0x2d8   : > { %2391 = vmatmul.mubr.bf16.gmra.mrb[136].mxu1 %v2085_v43  ;;  %v3652_v53 = vpop.eup %3651  ;;  %v1713_v12 = vpop.f32.mrb[116].mxu0 }
 0x2d9   : > { %v3298_v54 = vpop.f32.mrb[104].mxu1  ;;  %v3654_v26 = vpop.eup %3653  ;;  %v1714_v56 = vadd.f32 %v1713_v12, %v4404_v36 }
 0x2da   : > { %v1897_v58 = vadd.f32 %v3298_v54, %v4416_v14  ;;  %v1715_v59 = vpop.f32.mrb[117].mxu0  ;;  %v1888_v61 = vpop.f32.mrb[105].mxu1  ;;  %v2088_v5 = vpack.c.bf16 %v3654_v26, %v3646_v16 }
 0x2db   : > { %v3656_v15 = vpop.eup %3655  ;;  %v1716_v57 = vadd.f32 %v1715_v59, %v4408_v2  ;;  %v1889_v0 = vadd.f32 %v1888_v61, %v4416_v14  ;;  %v1717_v62 = vpop.f32.mrb[118].mxu0  ;;  %3669 = vtanh.f32 %v1714_v56 }
 0x2dc   : > { %v3299_v4 = vpop.f32.mrb[106].mxu1  ;;  %v3658_v42 = vpop.eup %3657  ;;  %v1718_v6 = vadd.f32 %v1717_v62, %v4404_v36  ;;  %v2090_v7 = vpack.c.bf16 %v3656_v15, %v3648_v51  ;;  %3671 = vtanh.f32 %v1897_v58 }
 0x2dd   : > { %v1719_v48 = vpop.f32.mrb[119].mxu0  ;;  %v1891_v19 = vpop.f32.mrb[107].mxu1  ;;  %v1900_v9 = vadd.f32 %v3299_v4, %v4416_v14  ;;  %v2089_v21 = vpack.c.bf16 %v3658_v42, %v3650_v52  ;;  %3673 = vtanh.f32 %v1716_v57 }
 0x2de   : > { %v3660_v8 = vpop.eup %3659  ;;  %v1720_v11 = vadd.f32 %v1719_v48, %v4408_v2  ;;  %3675 = vtanh.f32 %v1889_v0  ;;  %v1892_v23 = vadd.f32 %v1891_v19, %v4416_v14 }
 0x2df   : > { %v3662_v10 = vpop.eup %3661  ;;  %v2087_v18 = vpack.c.bf16 %v3660_v8, %v3652_v53  ;;  %2398 = vmatprep.mubr.bf16.mxu1 %v2089_v21  ;;  %3677 = vtanh.f32 %v1718_v6 }
 0x2e0   : > { %v3664_v22 = vpop.eup %3663  ;;  %2399 = vmatmul.mubr.bf16.gmra.mrb[140].mxu1 %v2088_v5  ;;  %3679 = vtanh.f32 %v1900_v9  ;;  %v1723_v45 = vpop.f32.mrb[120].mxu0 }
 0x2e1   : > { %v3666_v37 = vpop.eup %3665  ;;  %3332 = vmatprep.mubr.msk.bf16.mxu0 %vm1156_vm2, %v2087_v18  ;;  %3681 = vtanh.f32 %v1720_v11  ;;  %v1724_v27 = vadd.f32 %v1723_v45, %v4404_v36  ;;  %v1725_v28 = vpop.f32.mrb[121].mxu0 }
 0x2e2   : > { %v3668_v1 = vpop.eup %3667  ;;  %3333 = vmatmul.mubr.msk.bf16.gmra.mrb[164].mxu0 %vm1156_vm2, %v2090_v7  ;;  %v2091_v24 = vpack.c.bf16 %v3666_v37, %v3662_v10  ;;  %3683 = vtanh.f32 %v1892_v23  ;;  %v1726_v20 = vadd.f32 %v1725_v28, %v4408_v2  ;;  %v1727_v30 = vpop.f32.mrb[122].mxu0 }
 0x2e3   : > { %v2092_v35 = vpack.c.bf16 %v3668_v1, %v3664_v22  ;;  %3685 = vtanh.f32 %v1724_v27  ;;  %v1728_v32 = vadd.f32 %v1727_v30, %v4404_v36  ;;  %v1729_v33 = vpop.f32.mrb[123].mxu0 }
 0x2e4   : > { %3687 = vtanh.f32 %v1726_v20  ;;  %v1730_v34 = vadd.f32 %v1729_v33, %v4408_v2 }
 0x2e5   : > { %2406 = vmatprep.mubr.bf16.mxu1 %v2092_v35  ;;  %v3670_v25 = vpop.eup %3669  ;;  %3689 = vtanh.f32 %v1728_v32 }
 0x2e6   : > { %v3672_v31 = vpop.eup %3671  ;;  %3691 = vtanh.f32 %v1730_v34 }
 0x2e7   : > { %v3674_v38 = vpop.eup %3673 }
 0x2e8   : > { %2407 = vmatmul.mubr.bf16.gmra.mrb[144].mxu1 %v2091_v24  ;;  %v3676_v60 = vpop.eup %3675  ;;  %v1733_v39 = vpop.f32.mrb[124].mxu0 }
 0x2e9   : > { %v3302_v3 = vpop.f32.mrb[108].mxu1  ;;  %v3678_v40 = vpop.eup %3677  ;;  %v1734_v29 = vadd.f32 %v1733_v39, %v4404_v36 }
 0x2ea   : > { %v1913_v17 = vadd.f32 %v3302_v3, %v4416_v14  ;;  %v1735_v41 = vpop.f32.mrb[125].mxu0  ;;  %v1904_v43 = vpop.f32.mrb[109].mxu1  ;;  %v2094_v63 = vpack.c.bf16 %v3678_v40, %v3670_v25 }
 0x2eb   : > { %v3680_v44 = vpop.eup %3679  ;;  %v1736_v46 = vadd.f32 %v1735_v41, %v4408_v2  ;;  %v1905_v47 = vadd.f32 %v1904_v43, %v4416_v14  ;;  %v1737_v49 = vpop.f32.mrb[126].mxu0  ;;  %3693 = vtanh.f32 %v1734_v29 }
 0x2ec   : > { %v3303_v55 = vpop.f32.mrb[110].mxu1  ;;  %v3682_v50 = vpop.eup %3681  ;;  %v1738_v13 = vadd.f32 %v1737_v49, %v4404_v36  ;;  %v2096_v52 = vpack.c.bf16 %v3680_v44, %v3672_v31  ;;  %3695 = vtanh.f32 %v1913_v17 }
 0x2ed   : > { %v1739_v16 = vpop.f32.mrb[127].mxu0  ;;  %v1907_v51 = vpop.f32.mrb[111].mxu1  ;;  %v1916_v12 = vadd.f32 %v3303_v55, %v4416_v14  ;;  %v2095_v54 = vpack.c.bf16 %v3682_v50, %v3674_v38  ;;  %3697 = vtanh.f32 %v1736_v46 }
 0x2ee   : > { %v3684_v53 = vpop.eup %3683  ;;  %v1740_v56 = vadd.f32 %v1739_v16, %v4408_v2  ;;  %3699 = vtanh.f32 %v1905_v47  ;;  %v1908_v61 = vadd.f32 %v1907_v51, %v4416_v14 }
 0x2ef   : > { %v3686_v26 = vpop.eup %3685  ;;  %v2093_v58 = vpack.c.bf16 %v3684_v53, %v3676_v60  ;;  %2414 = vmatprep.mubr.bf16.mxu1 %v2095_v54  ;;  %3701 = vtanh.f32 %v1738_v13 }
 0x2f0   : > { %v3688_v59 = vpop.eup %3687  ;;  %2415 = vmatmul.mubr.bf16.gmra.mrb[148].mxu1 %v2094_v63  ;;  %3703 = vtanh.f32 %v1916_v12  ;;  %v1743_v0 = vpop.f32.mrb[128].mxu0 }
 0x2f1   : > { %v3690_v15 = vpop.eup %3689  ;;  %3336 = vmatprep.mubr.msk.bf16.mxu0 %vm1156_vm2, %v2093_v58  ;;  %3705 = vtanh.f32 %v1740_v56  ;;  %v1744_v4 = vadd.f32 %v1743_v0, %v4404_v36  ;;  %v1745_v5 = vpop.f32.mrb[129].mxu0 }
 0x2f2   : > { %v3692_v57 = vpop.eup %3691  ;;  %3337 = vmatmul.mubr.msk.bf16.gmra.mrb[168].mxu0 %vm1156_vm2, %v2096_v52  ;;  %v2097_v62 = vpack.c.bf16 %v3690_v15, %v3686_v26  ;;  %3707 = vtanh.f32 %v1908_v61  ;;  %v1746_v6 = vadd.f32 %v1745_v5, %v4408_v2  ;;  %v1747_v48 = vpop.f32.mrb[130].mxu0 }
 0x2f3   : > { %v2098_v42 = vpack.c.bf16 %v3692_v57, %v3688_v59  ;;  %3709 = vtanh.f32 %v1744_v4  ;;  %v1748_v19 = vadd.f32 %v1747_v48, %v4404_v36  ;;  %v1749_v7 = vpop.f32.mrb[131].mxu0 }
 0x2f4   : > { %3711 = vtanh.f32 %v1746_v6  ;;  %v1750_v8 = vadd.f32 %v1749_v7, %v4408_v2 }
 0x2f5   : > { %2422 = vmatprep.mubr.bf16.mxu1 %v2098_v42  ;;  %v3694_v9 = vpop.eup %3693  ;;  %3713 = vtanh.f32 %v1748_v19 }
 0x2f6   : > { %v3696_v21 = vpop.eup %3695  ;;  %3715 = vtanh.f32 %v1750_v8 }
 0x2f7   : > { %v3698_v10 = vpop.eup %3697 }
 0x2f8   : > { %2423 = vmatmul.mubr.bf16.gmra.mrb[152].mxu1 %v2097_v62  ;;  %v3700_v11 = vpop.eup %3699  ;;  %v1753_v18 = vpop.f32.mrb[132].mxu0 }
 0x2f9   : > { %v3306_v22 = vpop.f32.mrb[112].mxu1  ;;  %v3702_v23 = vpop.eup %3701  ;;  %v1754_v37 = vadd.f32 %v1753_v18, %v4404_v36 }
 0x2fa   : > { %v1929_v1 = vadd.f32 %v3306_v22, %v4416_v14  ;;  %v1755_v45 = vpop.f32.mrb[133].mxu0  ;;  %v1920_v24 = vpop.f32.mrb[113].mxu1  ;;  %v2100_v32 = vpack.c.bf16 %v3702_v23, %v3694_v9 }
 0x2fb   : > { %v3704_v27 = vpop.eup %3703  ;;  %v1756_v28 = vadd.f32 %v1755_v45, %v4408_v2  ;;  %v1921_v35 = vadd.f32 %v1920_v24, %v4416_v14  ;;  %v1757_v20 = vpop.f32.mrb[134].mxu0  ;;  %3717 = vtanh.f32 %v1754_v37 }
 0x2fc   : > { %v3307_v30 = vpop.f32.mrb[114].mxu1  ;;  %v3706_v33 = vpop.eup %3705  ;;  %v1758_v34 = vadd.f32 %v1757_v20, %v4404_v36  ;;  %v2102_v38 = vpack.c.bf16 %v3704_v27, %v3696_v21  ;;  %3719 = vtanh.f32 %v1929_v1 }
 0x2fd   : > { %v1759_v25 = vpop.f32.mrb[135].mxu0  ;;  %v1923_v31 = vpop.f32.mrb[115].mxu1  ;;  %v1932_v39 = vadd.f32 %v3307_v30, %v4416_v14  ;;  %v2101_v3 = vpack.c.bf16 %v3706_v33, %v3698_v10  ;;  %3721 = vtanh.f32 %v1756_v28 }
 0x2fe   : > { %v3708_v60 = vpop.eup %3707  ;;  %v1760_v29 = vadd.f32 %v1759_v25, %v4408_v2  ;;  %3723 = vtanh.f32 %v1921_v35  ;;  %v1924_v43 = vadd.f32 %v1923_v31, %v4416_v14 }
 0x2ff   : > { %v3710_v40 = vpop.eup %3709  ;;  %v2099_v17 = vpack.c.bf16 %v3708_v60, %v3700_v11  ;;  %2430 = vmatprep.mubr.bf16.mxu1 %v2101_v3  ;;  %3725 = vtanh.f32 %v1758_v34 }
 0x300   : > { %v3712_v41 = vpop.eup %3711  ;;  %2431 = vmatmul.mubr.bf16.gmra.mrb[156].mxu1 %v2100_v32  ;;  %3727 = vtanh.f32 %v1932_v39  ;;  %v1763_v47 = vpop.f32.mrb[136].mxu0 }
 0x301   : > { %v3714_v44 = vpop.eup %3713  ;;  %3340 = vmatprep.mubr.msk.bf16.mxu0 %vm1156_vm2, %v2099_v17  ;;  %3729 = vtanh.f32 %v1760_v29  ;;  %v1764_v55 = vadd.f32 %v1763_v47, %v4404_v36  ;;  %v1765_v63 = vpop.f32.mrb[137].mxu0 }
 0x302   : > { %v3716_v46 = vpop.eup %3715  ;;  %3341 = vmatmul.mubr.msk.bf16.gmra.mrb[172].mxu0 %vm1156_vm2, %v2102_v38  ;;  %v2103_v49 = vpack.c.bf16 %v3714_v44, %v3710_v40  ;;  %3731 = vtanh.f32 %v1924_v43  ;;  %v1766_v13 = vadd.f32 %v1765_v63, %v4408_v2  ;;  %v1767_v16 = vpop.f32.mrb[138].mxu0 }
 0x303   : > { %v2104_v50 = vpack.c.bf16 %v3716_v46, %v3712_v41  ;;  %3733 = vtanh.f32 %v1764_v55  ;;  %v1768_v51 = vadd.f32 %v1767_v16, %v4404_v36  ;;  %v1769_v52 = vpop.f32.mrb[139].mxu0 }
 0x304   : > { %3735 = vtanh.f32 %v1766_v13  ;;  %v1770_v53 = vadd.f32 %v1769_v52, %v4408_v2 }
 0x305   : > { %2438 = vmatprep.mubr.bf16.mxu1 %v2104_v50  ;;  %v3718_v12 = vpop.eup %3717  ;;  %3737 = vtanh.f32 %v1768_v51 }
 0x306   : > { %v3720_v54 = vpop.eup %3719  ;;  %3739 = vtanh.f32 %v1770_v53 }
 0x307   : > { %v3722_v26 = vpop.eup %3721 }
 0x308   : > { %2439 = vmatmul.mubr.bf16.gmra.mrb[160].mxu1 %v2103_v49  ;;  %v3724_v56 = vpop.eup %3723  ;;  %v1773_v58 = vpop.f32.mrb[140].mxu0 }
 0x309   : > { %v3310_v59 = vpop.f32.mrb[116].mxu1  ;;  %v3726_v61 = vpop.eup %3725  ;;  %v1774_v15 = vadd.f32 %v1773_v58, %v4404_v36 }
 0x30a   : > { %v1945_v57 = vadd.f32 %v3310_v59, %v4416_v14  ;;  %v1775_v0 = vpop.f32.mrb[141].mxu0  ;;  %v1936_v62 = vpop.f32.mrb[117].mxu1  ;;  %v2106_v19 = vpack.c.bf16 %v3726_v61, %v3718_v12 }
 0x30b   : > { %v3728_v4 = vpop.eup %3727  ;;  %v1776_v5 = vadd.f32 %v1775_v0, %v4408_v2  ;;  %v1937_v42 = vadd.f32 %v1936_v62, %v4416_v14  ;;  %v1777_v6 = vpop.f32.mrb[142].mxu0  ;;  %3741 = vtanh.f32 %v1774_v15 }
 0x30c   : > { %v3311_v48 = vpop.f32.mrb[118].mxu1  ;;  %v3730_v7 = vpop.eup %3729  ;;  %v1778_v8 = vadd.f32 %v1777_v6, %v4404_v36  ;;  %v2108_v10 = vpack.c.bf16 %v3728_v4, %v3720_v54  ;;  %3743 = vtanh.f32 %v1945_v57 }
 0x30d   : > { %v1779_v9 = vpop.f32.mrb[143].mxu0  ;;  %v1939_v21 = vpop.f32.mrb[119].mxu1  ;;  %v1948_v18 = vadd.f32 %v3311_v48, %v4416_v14  ;;  %v2107_v22 = vpack.c.bf16 %v3730_v7, %v3722_v26  ;;  %3745 = vtanh.f32 %v1776_v5 }
 0x30e   : > { %v3732_v11 = vpop.eup %3731  ;;  %v1780_v37 = vadd.f32 %v1779_v9, %v4408_v2  ;;  %3747 = vtanh.f32 %v1937_v42  ;;  %v1940_v24 = vadd.f32 %v1939_v21, %v4416_v14 }
 0x30f   : > { %v3734_v23 = vpop.eup %3733  ;;  %v2105_v1 = vpack.c.bf16 %v3732_v11, %v3724_v56  ;;  %2446 = vmatprep.mubr.bf16.mxu1 %v2107_v22  ;;  %3749 = vtanh.f32 %v1778_v8 }
 0x310   : > { %v3736_v45 = vpop.eup %3735  ;;  %2447 = vmatmul.mubr.bf16.gmra.mrb[164].mxu1 %v2106_v19  ;;  %3751 = vtanh.f32 %v1948_v18  ;;  %v1783_v35 = vpop.f32.mrb[144].mxu0 }
 0x311   : > { %v3738_v27 = vpop.eup %3737  ;;  %3344 = vmatprep.mubr.msk.bf16.mxu0 %vm1156_vm2, %v2105_v1  ;;  %3753 = vtanh.f32 %v1780_v37  ;;  %v1784_v30 = vadd.f32 %v1783_v35, %v4404_v36  ;;  %v1785_v32 = vpop.f32.mrb[145].mxu0 }
 0x312   : > { %v3740_v28 = vpop.eup %3739  ;;  %3345 = vmatmul.mubr.msk.bf16.gmra.mrb[176].mxu0 %vm1156_vm2, %v2108_v10  ;;  %v2109_v20 = vpack.c.bf16 %v3738_v27, %v3734_v23  ;;  %3755 = vtanh.f32 %v1940_v24  ;;  %v1786_v34 = vadd.f32 %v1785_v32, %v4408_v2  ;;  %v1787_v25 = vpop.f32.mrb[146].mxu0 }
 0x313   : > { %v2110_v33 = vpack.c.bf16 %v3740_v28, %v3736_v45  ;;  %3757 = vtanh.f32 %v1784_v30  ;;  %v1788_v31 = vadd.f32 %v1787_v25, %v4404_v36  ;;  %v1789_v38 = vpop.f32.mrb[147].mxu0 }
 0x314   : > { %3759 = vtanh.f32 %v1786_v34  ;;  %v1790_v60 = vadd.f32 %v1789_v38, %v4408_v2 }
 0x315   : > { %2454 = vmatprep.mubr.bf16.mxu1 %v2110_v33  ;;  %v3742_v39 = vpop.eup %3741  ;;  %3761 = vtanh.f32 %v1788_v31 }
 0x316   : > { %v3744_v3 = vpop.eup %3743  ;;  %3763 = vtanh.f32 %v1790_v60 }
 0x317   : > { %v3746_v40 = vpop.eup %3745 }
 0x318   : > { %2455 = vmatmul.mubr.bf16.gmra.mrb[168].mxu1 %v2109_v20  ;;  %v3748_v29 = vpop.eup %3747  ;;  %v1793_v17 = vpop.f32.mrb[148].mxu0 }
 0x319   : > { %v3314_v41 = vpop.f32.mrb[120].mxu1  ;;  %v3750_v43 = vpop.eup %3749  ;;  %v1794_v44 = vadd.f32 %v1793_v17, %v4404_v36 }
 0x31a   : > { %v1961_v46 = vadd.f32 %v3314_v41, %v4416_v14  ;;  %v1795_v47 = vpop.f32.mrb[149].mxu0  ;;  %v1952_v49 = vpop.f32.mrb[121].mxu1  ;;  %v2112_v51 = vpack.c.bf16 %v3750_v43, %v3742_v39 }
 0x31b   : > { %v3752_v55 = vpop.eup %3751  ;;  %v1796_v63 = vadd.f32 %v1795_v47, %v4408_v2  ;;  %v1953_v50 = vadd.f32 %v1952_v49, %v4416_v14  ;;  %v1797_v13 = vpop.f32.mrb[150].mxu0  ;;  %3765 = vtanh.f32 %v1794_v44 }
 0x31c   : > { %v3315_v16 = vpop.f32.mrb[122].mxu1  ;;  %v3754_v52 = vpop.eup %3753  ;;  %v1798_v53 = vadd.f32 %v1797_v13, %v4404_v36  ;;  %v2114_v26 = vpack.c.bf16 %v3752_v55, %v3744_v3  ;;  %3767 = vtanh.f32 %v1961_v46 }
 0x31d   : > { %v1799_v12 = vpop.f32.mrb[151].mxu0  ;;  %v1955_v54 = vpop.f32.mrb[123].mxu1  ;;  %v1964_v58 = vadd.f32 %v3315_v16, %v4416_v14  ;;  %v2113_v59 = vpack.c.bf16 %v3754_v52, %v3746_v40  ;;  %3769 = vtanh.f32 %v1796_v63 }
 0x31e   : > { %v3756_v56 = vpop.eup %3755  ;;  %v1800_v15 = vadd.f32 %v1799_v12, %v4408_v2  ;;  %3771 = vtanh.f32 %v1953_v50  ;;  %v1956_v62 = vadd.f32 %v1955_v54, %v4416_v14 }
 0x31f   : > { %v3758_v61 = vpop.eup %3757  ;;  %v2111_v57 = vpack.c.bf16 %v3756_v56, %v3748_v29  ;;  %2462 = vmatprep.mubr.bf16.mxu1 %v2113_v59  ;;  %3773 = vtanh.f32 %v1798_v53 }
 0x320   : > { %v3760_v0 = vpop.eup %3759  ;;  %2463 = vmatmul.mubr.bf16.gmra.mrb[172].mxu1 %v2112_v51  ;;  %3775 = vtanh.f32 %v1964_v58  ;;  %v1803_v42 = vpop.f32.mrb[152].mxu0 }
 0x321   : > { %v3762_v4 = vpop.eup %3761  ;;  %3348 = vmatprep.mubr.msk.bf16.mxu0 %vm1156_vm2, %v2111_v57  ;;  %3777 = vtanh.f32 %v1800_v15  ;;  %v1804_v48 = vadd.f32 %v1803_v42, %v4404_v36  ;;  %v1805_v19 = vpop.f32.mrb[153].mxu0 }
 0x322   : > { %v3764_v5 = vpop.eup %3763  ;;  %3349 = vmatmul.mubr.msk.bf16.gmra.mrb[180].mxu0 %vm1156_vm2, %v2114_v26  ;;  %v2115_v6 = vpack.c.bf16 %v3762_v4, %v3758_v61  ;;  %3779 = vtanh.f32 %v1956_v62  ;;  %v1806_v8 = vadd.f32 %v1805_v19, %v4408_v2  ;;  %v1807_v9 = vpop.f32.mrb[154].mxu0  ;;  %v4529_v4 = vld [vmem:[%s4645_s8] ss:$0 sm:$0xff] }
 0x323   : > { %v2116_v7 = vpack.c.bf16 %v3764_v5, %v3760_v0  ;;  %3781 = vtanh.f32 %v1804_v48  ;;  %v1808_v21 = vadd.f32 %v1807_v9, %v4404_v36  ;;  %v1809_v10 = vpop.f32.mrb[155].mxu0 }
 0x324   : > { %3783 = vtanh.f32 %v1806_v8  ;;  %v1810_v11 = vadd.f32 %v1809_v10, %v4408_v2 }
 0x325   : > { %2470 = vmatprep.mubr.bf16.mxu1 %v2116_v7  ;;  %v3766_v18 = vpop.eup %3765  ;;  %3785 = vtanh.f32 %v1808_v21 }
 0x326   : > { %v3768_v22 = vpop.eup %3767  ;;  %3787 = vtanh.f32 %v1810_v11 }
 0x327   : > { %v3770_v23 = vpop.eup %3769 }
 0x328   : > { %2471 = vmatmul.mubr.bf16.gmra.mrb[176].mxu1 %v2115_v6  ;;  %v3772_v37 = vpop.eup %3771  ;;  %v1813_v1 = vpop.f32.mrb[156].mxu0 }
 0x329   : > { %v3318_v45 = vpop.f32.mrb[124].mxu1  ;;  %v3774_v24 = vpop.eup %3773  ;;  %v1814_v27 = vadd.f32 %v1813_v1, %v4404_v36 }
 0x32a   : > { %v1977_v28 = vadd.f32 %v3318_v45, %v4416_v14  ;;  %v1815_v35 = vpop.f32.mrb[157].mxu0  ;;  %v1968_v20 = vpop.f32.mrb[125].mxu1  ;;  %v2118_v31 = vpack.c.bf16 %v3774_v24, %v3766_v18 }
 0x32b   : > { %v3776_v30 = vpop.eup %3775  ;;  %v1816_v32 = vadd.f32 %v1815_v35, %v4408_v2  ;;  %v1969_v33 = vadd.f32 %v1968_v20, %v4416_v14  ;;  %v1817_v34 = vpop.f32.mrb[158].mxu0  ;;  %3789 = vtanh.f32 %v1814_v27 }
 0x32c   : > { %v3319_v25 = vpop.f32.mrb[126].mxu1  ;;  %v3778_v38 = vpop.eup %3777  ;;  %v1818_v60 = vadd.f32 %v1817_v34, %v4404_v36  ;;  %v2120_v40 = vpack.c.bf16 %v3776_v30, %v3768_v22  ;;  %3791 = vtanh.f32 %v1977_v28 }
 0x32d   : > { %v1819_v39 = vpop.f32.mrb[159].mxu0  ;;  %v1971_v3 = vpop.f32.mrb[127].mxu1  ;;  %v1980_v17 = vadd.f32 %v3319_v25, %v4416_v14  ;;  %v2119_v41 = vpack.c.bf16 %v3778_v38, %v3770_v23  ;;  %3793 = vtanh.f32 %v1816_v32 }
 0x32e   : > { %v3780_v29 = vpop.eup %3779  ;;  %v1820_v44 = vadd.f32 %v1819_v39, %v4408_v2  ;;  %3795 = vtanh.f32 %v1969_v33  ;;  %v1972_v49 = vadd.f32 %v1971_v3, %v4416_v14 }
 0x32f   : > { %v3782_v43 = vpop.eup %3781  ;;  %v2117_v46 = vpack.c.bf16 %v3780_v29, %v3772_v37  ;;  %2478 = vmatprep.mubr.bf16.mxu1 %v2119_v41  ;;  %3797 = vtanh.f32 %v1818_v60 }
 0x330   : > { %v3784_v47 = vpop.eup %3783  ;;  %2479 = vmatmul.mubr.bf16.gmra.mrb[180].mxu1 %v2118_v31  ;;  %3799 = vtanh.f32 %v1980_v17 }
 0x331   : > { %v3786_v55 = vpop.eup %3785  ;;  %3352 = vmatprep.mubr.msk.bf16.mxu0 %vm1156_vm2, %v2117_v46  ;;  %3801 = vtanh.f32 %v1820_v44 }
 0x332   : > { %v3788_v36 = vpop.eup %3787  ;;  %3353 = vmatmul.mubr.msk.bf16.gmra.mrb[184].mxu0 %vm1156_vm2, %v2120_v40  ;;  %v2121_v63 = vpack.c.bf16 %v3786_v55, %v3782_v43  ;;  %3803 = vtanh.f32 %v1972_v49 }
 0x333   : > { %v2122_v50 = vpack.c.bf16 %v3788_v36, %v3784_v47 }
 0x335   : > { %2486 = vmatprep.mubr.bf16.mxu1 %v2122_v50  ;;  %v3790_v2 = vpop.eup %3789 }
 0x336   : > { %v3792_v13 = vpop.eup %3791 }
 0x337   : > { %v3794_v16 = vpop.eup %3793 }
 0x338   : > { %2487 = vmatmul.mubr.bf16.gmra.mrb[184].mxu1 %v2121_v63  ;;  %v3796_v14 = vpop.eup %3795 }
 0x339   : > { %v3798_v51 = vpop.eup %3797 }
 0x33a   : > { %v3800_v52 = vpop.eup %3799  ;;  %v2124_v53 = vpack.c.bf16 %v3798_v51, %v3790_v2 }
 0x33b   : > { %v3802_v12 = vpop.eup %3801  ;;  %v2126_v54 = vpack.c.bf16 %v3800_v52, %v3792_v13 }
 0x33c   : > { %v3804_v26 = vpop.eup %3803  ;;  %v2125_v56 = vpack.c.bf16 %v3802_v12, %v3794_v16 }
 0x33d   : > { %v2123_v58 = vpack.c.bf16 %v3804_v26, %v3796_v14 }
 0x33e   : > { %2494 = vmatprep.mubr.bf16.mxu1 %v2125_v56 }
 0x33f   : > { %3356 = vmatprep.mubr.msk.bf16.mxu0 %vm1156_vm2, %v2123_v58 }
 0x340   : > { %2495 = vmatmul.mubr.bf16.gmra.mrb[188].mxu1 %v2124_v53  ;;  %3357 = vmatmul.mubr.msk.bf16.gmra.mrb[188].mxu0 %vm1156_vm2, %v2126_v54 }
 0x397   : > { %v3094_v59 = vpop.f32.mrb[128].mxu1 }
 0x398   : > { %v3095_v61 = vpop.f32.mrb[129].mxu1 }
 0x399   : > { %v3096_v15 = vadd.f32 %v3095_v61, %v3094_v59  ;;  %v3097_v57 = vpop.f32.mrb[130].mxu1 }
 0x39a   : > { %v3098_v0 = vpop.f32.mrb[131].mxu1 }
 0x39b   : > { %v3099_v62 = vadd.f32 %v3098_v0, %v3097_v57  ;;  %v2377_v48 = vadd.f32 %v3096_v15, %v4529_v4 }
 0x39d   : > { %v2380_v11 = vadd.f32 %v3099_v62, %v4529_v4 }
 0x3a3   : > { %v3100_v5 = vpop.f32.mrb[132].mxu1 }
 0x3a4   : > { %v3101_v6 = vpop.f32.mrb[133].mxu1 }
 0x3a5   : > { %v3330_v42 = vpop.f32.mrb[160].mxu0  ;;  %v3102_v19 = vadd.f32 %v3101_v6, %v3100_v5  ;;  %v3103_v8 = vpop.f32.mrb[134].mxu1 }
 0x3a6   : > { %v2537_v7 = vpop.f32.mrb[161].mxu0  ;;  %v3104_v10 = vpop.f32.mrb[135].mxu1 }
 0x3a7   : > { %v2538_v9 = vadd.f32 %v2537_v7, %v2377_v48  ;;  %v3331_v21 = vpop.f32.mrb[162].mxu0  ;;  %v2385_v18 = vadd.f32 %v3102_v19, %v4529_v4  ;;  %v3105_v22 = vadd.f32 %v3104_v10, %v3103_v8 }
 0x3a8   : > { %v2540_v23 = vpop.f32.mrb[163].mxu0 }
 0x3a9   : > { %2664 = vst.msk [vmem:[%s4537_s14] sm:$0xff] %vm442_vm0, %v2538_v9  ;;  %v2541_v37 = vadd.f32 %v2540_v23, %v2380_v11  ;;  %v2546_v1 = vadd.f32 %v3330_v42, %v2385_v18  ;;  %v2388_v45 = vadd.f32 %v3105_v22, %v4529_v4 }
 0x3ab   : > { %2665 = vst.msk [vmem:[%s4537_s14 + $0x8] sm:$0xff] %vm442_vm0, %v2541_v37  ;;  %2666 = vst.msk [vmem:[%s4537_s14 + $0x10] sm:$0xff] %vm442_vm0, %v2546_v1  ;;  %v2549_v24 = vadd.f32 %v3331_v21, %v2388_v45  ;;  %v3106_v27 = vpop.f32.mrb[136].mxu1 }
 0x3ac   : > { %v3107_v28 = vpop.f32.mrb[137].mxu1 }
 0x3ad   : > { %2667 = vst.msk [vmem:[%s4537_s14 + $0x18] sm:$0xff] %vm442_vm0, %v2549_v24  ;;  %v3108_v35 = vadd.f32 %v3107_v28, %v3106_v27  ;;  %v3109_v20 = vpop.f32.mrb[138].mxu1 }
 0x3ae   : > { %v3110_v30 = vpop.f32.mrb[139].mxu1 }
 0x3af   : > { %v3111_v32 = vadd.f32 %v3110_v30, %v3109_v20  ;;  %v2393_v31 = vadd.f32 %v3108_v35, %v4529_v4 }
 0x3b1   : > { %v2396_v17 = vadd.f32 %v3111_v32, %v4529_v4 }
 0x3b3   : > { %v3112_v33 = vpop.f32.mrb[140].mxu1 }
 0x3b4   : > { %v3113_v25 = vpop.f32.mrb[141].mxu1 }
 0x3b5   : > { %v3334_v34 = vpop.f32.mrb[164].mxu0  ;;  %v3114_v38 = vadd.f32 %v3113_v25, %v3112_v33  ;;  %v3115_v39 = vpop.f32.mrb[142].mxu1 }
 0x3b6   : > { %v2553_v60 = vpop.f32.mrb[165].mxu0  ;;  %v3116_v29 = vpop.f32.mrb[143].mxu1 }
 0x3b7   : > { %v2554_v3 = vadd.f32 %v2553_v60, %v2393_v31  ;;  %v3335_v40 = vpop.f32.mrb[166].mxu0  ;;  %v2401_v41 = vadd.f32 %v3114_v38, %v4529_v4  ;;  %v3117_v43 = vadd.f32 %v3116_v29, %v3115_v39 }
 0x3b8   : > { %v2556_v44 = vpop.f32.mrb[167].mxu0 }
 0x3b9   : > { %2668 = vst.msk [vmem:[%s4537_s14 + $0x20] sm:$0xff] %vm442_vm0, %v2554_v3  ;;  %v2557_v46 = vadd.f32 %v2556_v44, %v2396_v17  ;;  %v2562_v47 = vadd.f32 %v3334_v34, %v2401_v41  ;;  %v2404_v49 = vadd.f32 %v3117_v43, %v4529_v4 }
 0x3bb   : > { %2669 = vst.msk [vmem:[%s4537_s14 + $0x28] sm:$0xff] %vm442_vm0, %v2557_v46  ;;  %2670 = vst.msk [vmem:[%s4537_s14 + $0x30] sm:$0xff] %vm442_vm0, %v2562_v47  ;;  %v2565_v55 = vadd.f32 %v3335_v40, %v2404_v49  ;;  %v3118_v36 = vpop.f32.mrb[144].mxu1 }
 0x3bc   : > { %v3119_v63 = vpop.f32.mrb[145].mxu1 }
 0x3bd   : > { %2671 = vst.msk [vmem:[%s4537_s14 + $0x38] sm:$0xff] %vm442_vm0, %v2565_v55  ;;  %v3120_v50 = vadd.f32 %v3119_v63, %v3118_v36  ;;  %v3121_v2 = vpop.f32.mrb[146].mxu1 }
 0x3be   : > { %v3122_v13 = vpop.f32.mrb[147].mxu1 }
 0x3bf   : > { %v3123_v16 = vadd.f32 %v3122_v13, %v3121_v2  ;;  %v2409_v53 = vadd.f32 %v3120_v50, %v4529_v4 }
 0x3c1   : > { %v2412_v61 = vadd.f32 %v3123_v16, %v4529_v4 }
 0x3c3   : > { %v3124_v14 = vpop.f32.mrb[148].mxu1 }
 0x3c4   : > { %v3125_v52 = vpop.f32.mrb[149].mxu1 }
 0x3c5   : > { %v3338_v51 = vpop.f32.mrb[168].mxu0  ;;  %v3126_v12 = vadd.f32 %v3125_v52, %v3124_v14  ;;  %v3127_v26 = vpop.f32.mrb[150].mxu1 }
 0x3c6   : > { %v2569_v54 = vpop.f32.mrb[169].mxu0  ;;  %v3128_v59 = vpop.f32.mrb[151].mxu1 }
 0x3c7   : > { %v2570_v56 = vadd.f32 %v2569_v54, %v2409_v53  ;;  %v3339_v58 = vpop.f32.mrb[170].mxu0  ;;  %v2417_v15 = vadd.f32 %v3126_v12, %v4529_v4  ;;  %v3129_v57 = vadd.f32 %v3128_v59, %v3127_v26 }
 0x3c8   : > { %v2572_v0 = vpop.f32.mrb[171].mxu0 }
 0x3c9   : > { %2672 = vst.msk [vmem:[%s4537_s14 + $0x40] sm:$0xff] %vm442_vm0, %v2570_v56  ;;  %v2573_v62 = vadd.f32 %v2572_v0, %v2412_v61  ;;  %v2578_v5 = vadd.f32 %v3338_v51, %v2417_v15  ;;  %v2420_v42 = vadd.f32 %v3129_v57, %v4529_v4 }
 0x3cb   : > { %2673 = vst.msk [vmem:[%s4537_s14 + $0x48] sm:$0xff] %vm442_vm0, %v2573_v62  ;;  %2674 = vst.msk [vmem:[%s4537_s14 + $0x50] sm:$0xff] %vm442_vm0, %v2578_v5  ;;  %v2581_v6 = vadd.f32 %v3339_v58, %v2420_v42  ;;  %v3130_v48 = vpop.f32.mrb[152].mxu1 }
 0x3cc   : > { %v3131_v19 = vpop.f32.mrb[153].mxu1 }
 0x3cd   : > { %2675 = vst.msk [vmem:[%s4537_s14 + $0x58] sm:$0xff] %vm442_vm0, %v2581_v6  ;;  %v3132_v7 = vadd.f32 %v3131_v19, %v3130_v48  ;;  %v3133_v8 = vpop.f32.mrb[154].mxu1 }
 0x3ce   : > { %v3134_v9 = vpop.f32.mrb[155].mxu1 }
 0x3cf   : > { %v3135_v21 = vadd.f32 %v3134_v9, %v3133_v8  ;;  %v2425_v22 = vadd.f32 %v3132_v7, %v4529_v4 }
 0x3d1   : > { %v2428_v28 = vadd.f32 %v3135_v21, %v4529_v4 }
 0x3d3   : > { %v3136_v10 = vpop.f32.mrb[156].mxu1 }
 0x3d4   : > { %v3137_v18 = vpop.f32.mrb[157].mxu1 }
 0x3d5   : > { %v3342_v11 = vpop.f32.mrb[172].mxu0  ;;  %v3138_v23 = vadd.f32 %v3137_v18, %v3136_v10  ;;  %v3139_v1 = vpop.f32.mrb[158].mxu1 }
 0x3d6   : > { %v2585_v37 = vpop.f32.mrb[173].mxu0  ;;  %v3140_v27 = vpop.f32.mrb[159].mxu1 }
 0x3d7   : > { %v2586_v45 = vadd.f32 %v2585_v37, %v2425_v22  ;;  %v3343_v24 = vpop.f32.mrb[174].mxu0  ;;  %v2433_v35 = vadd.f32 %v3138_v23, %v4529_v4  ;;  %v3141_v20 = vadd.f32 %v3140_v27, %v3139_v1 }
 0x3d8   : > { %v2588_v30 = vpop.f32.mrb[175].mxu0 }
 0x3d9   : > { %2676 = vst.msk [vmem:[%s4537_s14 + $0x60] sm:$0xff] %vm442_vm0, %v2586_v45  ;;  %v2589_v32 = vadd.f32 %v2588_v30, %v2428_v28  ;;  %v2594_v33 = vadd.f32 %v3342_v11, %v2433_v35  ;;  %v2436_v34 = vadd.f32 %v3141_v20, %v4529_v4 }
 0x3db   : > { %2677 = vst.msk [vmem:[%s4537_s14 + $0x68] sm:$0xff] %vm442_vm0, %v2589_v32  ;;  %2678 = vst.msk [vmem:[%s4537_s14 + $0x70] sm:$0xff] %vm442_vm0, %v2594_v33  ;;  %v2597_v25 = vadd.f32 %v3343_v24, %v2436_v34  ;;  %v3142_v31 = vpop.f32.mrb[160].mxu1 }
 0x3dc   : > { %v3143_v38 = vpop.f32.mrb[161].mxu1 }
 0x3dd   : > { %2679 = vst.msk [vmem:[%s4537_s14 + $0x78] sm:$0xff] %vm442_vm0, %v2597_v25  ;;  %v3144_v60 = vadd.f32 %v3143_v38, %v3142_v31  ;;  %v3145_v39 = vpop.f32.mrb[162].mxu1 }
 0x3de   : > { %v3146_v3 = vpop.f32.mrb[163].mxu1 }
 0x3df   : > { %v3147_v40 = vadd.f32 %v3146_v3, %v3145_v39  ;;  %v2441_v43 = vadd.f32 %v3144_v60, %v4529_v4 }
 0x3e1   : > { %v2444_v63 = vadd.f32 %v3147_v40, %v4529_v4 }
 0x3e3   : > { %v3148_v29 = vpop.f32.mrb[164].mxu1 }
 0x3e4   : > { %v3149_v41 = vpop.f32.mrb[165].mxu1 }
 0x3e5   : > { %v3346_v17 = vpop.f32.mrb[176].mxu0  ;;  %v3150_v44 = vadd.f32 %v3149_v41, %v3148_v29  ;;  %v3151_v47 = vpop.f32.mrb[166].mxu1 }
 0x3e6   : > { %v2601_v46 = vpop.f32.mrb[177].mxu0  ;;  %v3152_v36 = vpop.f32.mrb[167].mxu1 }
 0x3e7   : > { %v2602_v49 = vadd.f32 %v2601_v46, %v2441_v43  ;;  %v3347_v55 = vpop.f32.mrb[178].mxu0  ;;  %v2449_v50 = vadd.f32 %v3150_v44, %v4529_v4  ;;  %v3153_v2 = vadd.f32 %v3152_v36, %v3151_v47 }
 0x3e8   : > { %v2604_v13 = vpop.f32.mrb[179].mxu0 }
 0x3e9   : > { %2680 = vst.msk [vmem:[%s4537_s14 + $0x80] sm:$0xff] %vm442_vm0, %v2602_v49  ;;  %v2605_v16 = vadd.f32 %v2604_v13, %v2444_v63  ;;  %v2610_v14 = vadd.f32 %v3346_v17, %v2449_v50  ;;  %v2452_v51 = vadd.f32 %v3153_v2, %v4529_v4 }
 0x3eb   : > { %2681 = vst.msk [vmem:[%s4537_s14 + $0x88] sm:$0xff] %vm442_vm0, %v2605_v16  ;;  %2682 = vst.msk [vmem:[%s4537_s14 + $0x90] sm:$0xff] %vm442_vm0, %v2610_v14  ;;  %v2613_v52 = vadd.f32 %v3347_v55, %v2452_v51  ;;  %v3154_v53 = vpop.f32.mrb[168].mxu1 }
 0x3ec   : > { %v3155_v12 = vpop.f32.mrb[169].mxu1 }
 0x3ed   : > { %2683 = vst.msk [vmem:[%s4537_s14 + $0x98] sm:$0xff] %vm442_vm0, %v2613_v52  ;;  %v3156_v54 = vadd.f32 %v3155_v12, %v3154_v53  ;;  %v3157_v26 = vpop.f32.mrb[170].mxu1 }
 0x3ee   : > { %v3158_v56 = vpop.f32.mrb[171].mxu1 }
 0x3ef   : > { %v3159_v58 = vadd.f32 %v3158_v56, %v3157_v26  ;;  %v2457_v57 = vadd.f32 %v3156_v54, %v4529_v4 }
 0x3f1   : > { %v2460_v19 = vadd.f32 %v3159_v58, %v4529_v4 }
 0x3f3   : > { %v3160_v59 = vpop.f32.mrb[172].mxu1 }
 0x3f4   : > { %v3161_v15 = vpop.f32.mrb[173].mxu1 }
 0x3f5   : > { %v3350_v61 = vpop.f32.mrb[180].mxu0  ;;  %v3162_v0 = vadd.f32 %v3161_v15, %v3160_v59  ;;  %v3163_v5 = vpop.f32.mrb[174].mxu1 }
 0x3f6   : > { %v2617_v62 = vpop.f32.mrb[181].mxu0  ;;  %v3164_v48 = vpop.f32.mrb[175].mxu1 }
 0x3f7   : > { %v2618_v42 = vadd.f32 %v2617_v62, %v2457_v57  ;;  %v3351_v6 = vpop.f32.mrb[182].mxu0  ;;  %v2465_v7 = vadd.f32 %v3162_v0, %v4529_v4  ;;  %v3165_v8 = vadd.f32 %v3164_v48, %v3163_v5 }
 0x3f8   : > { %v2620_v9 = vpop.f32.mrb[183].mxu0 }
 0x3f9   : > { %2684 = vst.msk [vmem:[%s4537_s14 + $0xa0] sm:$0xff] %vm442_vm0, %v2618_v42  ;;  %v2621_v21 = vadd.f32 %v2620_v9, %v2460_v19  ;;  %v2626_v10 = vadd.f32 %v3350_v61, %v2465_v7  ;;  %v2468_v11 = vadd.f32 %v3165_v8, %v4529_v4 }
 0x3fb   : > { %2685 = vst.msk [vmem:[%s4537_s14 + $0xa8] sm:$0xff] %vm442_vm0, %v2621_v21  ;;  %2686 = vst.msk [vmem:[%s4537_s14 + $0xb0] sm:$0xff] %vm442_vm0, %v2626_v10  ;;  %v2629_v18 = vadd.f32 %v3351_v6, %v2468_v11  ;;  %v3166_v22 = vpop.f32.mrb[176].mxu1 }
 0x3fc   : > { %v3167_v23 = vpop.f32.mrb[177].mxu1 }
 0x3fd   : > { %2687 = vst.msk [vmem:[%s4537_s14 + $0xb8] sm:$0xff] %vm442_vm0, %v2629_v18  ;;  %v3168_v37 = vadd.f32 %v3167_v23, %v3166_v22  ;;  %v3169_v1 = vpop.f32.mrb[178].mxu1 }
 0x3fe   : > { %v3170_v45 = vpop.f32.mrb[179].mxu1 }
 0x3ff   : > { %v3171_v24 = vadd.f32 %v3170_v45, %v3169_v1  ;;  %v2473_v20 = vadd.f32 %v3168_v37, %v4529_v4 }
 0x401   : > { %v2476_v38 = vadd.f32 %v3171_v24, %v4529_v4 }
 0x403   : > { %v3172_v27 = vpop.f32.mrb[180].mxu1 }
 0x404   : > { %v3173_v35 = vpop.f32.mrb[181].mxu1 }
 0x405   : > { %v3354_v28 = vpop.f32.mrb[184].mxu0  ;;  %v3174_v30 = vadd.f32 %v3173_v35, %v3172_v27  ;;  %v3175_v33 = vpop.f32.mrb[182].mxu1 }
 0x406   : > { %v2633_v32 = vpop.f32.mrb[185].mxu0  ;;  %v3176_v31 = vpop.f32.mrb[183].mxu1 }
 0x407   : > { %v2634_v34 = vadd.f32 %v2633_v32, %v2473_v20  ;;  %v3355_v25 = vpop.f32.mrb[186].mxu0  ;;  %v2481_v60 = vadd.f32 %v3174_v30, %v4529_v4  ;;  %v3177_v39 = vadd.f32 %v3176_v31, %v3175_v33 }
 0x408   : > { %v2636_v3 = vpop.f32.mrb[187].mxu0 }
 0x409   : > { %2688 = vst.msk [vmem:[%s4537_s14 + $0xc0] sm:$0xff] %vm442_vm0, %v2634_v34  ;;  %v2637_v40 = vadd.f32 %v2636_v3, %v2476_v38  ;;  %v2642_v29 = vadd.f32 %v3354_v28, %v2481_v60  ;;  %v2484_v17 = vadd.f32 %v3177_v39, %v4529_v4 }
 0x40b   : > { %2689 = vst.msk [vmem:[%s4537_s14 + $0xc8] sm:$0xff] %vm442_vm0, %v2637_v40  ;;  %2690 = vst.msk [vmem:[%s4537_s14 + $0xd0] sm:$0xff] %vm442_vm0, %v2642_v29  ;;  %v2645_v41 = vadd.f32 %v3355_v25, %v2484_v17  ;;  %v3178_v43 = vpop.f32.mrb[184].mxu1 }
 0x40c   : > { %v3179_v44 = vpop.f32.mrb[185].mxu1 }
 0x40d   : > { %2691 = vst.msk [vmem:[%s4537_s14 + $0xd8] sm:$0xff] %vm442_vm0, %v2645_v41  ;;  %v3180_v46 = vadd.f32 %v3179_v44, %v3178_v43  ;;  %v3181_v47 = vpop.f32.mrb[186].mxu1 }
 0x40e   : > { %v3182_v49 = vpop.f32.mrb[187].mxu1 }
 0x40f   : > { %v3183_v55 = vadd.f32 %v3182_v49, %v3181_v47  ;;  %v2489_v2 = vadd.f32 %v3180_v46, %v4529_v4 }
 0x411   : > { %v2492_v12 = vadd.f32 %v3183_v55, %v4529_v4 }
 0x413   : > { %v3184_v36 = vpop.f32.mrb[188].mxu1  ;;  %v3358_v63 = vpop.f32.mrb[188].mxu0 }
 0x414   : > { %v3185_v50 = vpop.f32.mrb[189].mxu1  ;;  %v2649_v16 = vpop.f32.mrb[189].mxu0 }
 0x415   : > { %v3186_v13 = vadd.f32 %v3185_v50, %v3184_v36  ;;  %v3187_v14 = vpop.f32.mrb[190].mxu1  ;;  %v2650_v51 = vadd.f32 %v2649_v16, %v2489_v2  ;;  %v3359_v52 = vpop.f32.mrb[190].mxu0 }
 0x416   : > { %v3188_v53 = vpop.f32.mrb[191].mxu1  ;;  %v2652_v56 = vpop.f32.mrb[191].mxu0 }
 0x417   : > { %v2497_v54 = vadd.f32 %v3186_v13, %v4529_v4  ;;  %v3189_v26 = vadd.f32 %v3188_v53, %v3187_v14  ;;  %2692 = vst.msk [vmem:[%s4537_s14 + $0xe0] sm:$0xff] %vm442_vm0, %v2650_v51  ;;  %v2653_v58 = vadd.f32 %v2652_v56, %v2492_v12 }
 0x419   : > { %v2658_v59 = vadd.f32 %v3358_v63, %v2497_v54  ;;  %v2500_v61 = vadd.f32 %v3189_v26, %v4529_v4  ;;  %2693 = vst.msk [vmem:[%s4537_s14 + $0xe8] sm:$0xff] %vm442_vm0, %v2653_v58 }
 0x41b   : > { %2694 = vst.msk [vmem:[%s4537_s14 + $0xf0] sm:$0xff] %vm442_vm0, %v2658_v59  ;;  %v2661_v15 = vadd.f32 %v3359_v52, %v2500_v61 }
 0x41d   : > { %2695 = vst.msk [vmem:[%s4537_s14 + $0xf8] sm:$0xff] %vm442_vm0, %v2661_v15 }
 0x41e PF: > { %s19_s30 = sadd.s32 1, %s3811_s30  }
 0x41f   : > { %p16_p4 = scmp.ge.s32.totalorder %s19_s30, 4  }
 0x421   :  { %18 = sbr.rel (!%p16_p4) target bundleno = 1 (0x1), region = 86 }

</bundles_post_ra>
